<compile_context>
chip_gen: v5e
topology: v5e:2x2
jax: 0.10.0
libtpu: 0.0.40
codegen_flags: <defaults>
</compile_context>

<pallas_src>
import math

import jax
import jax.numpy as jnp
from jax.experimental import pallas as pl
from jax.experimental.pallas import tpu as pltpu


def _round_up(v, m):
    return ((v + m - 1) // m) * m


def _pack_factor(depth, pn):
    """Points packed per 128-lane matmul row (block-diagonal weight trick)."""
    if depth <= 128 and 128 % depth == 0:
        return max(1, math.gcd(128 // depth, pn))
    return 1


def point_cloud_decoder(x, kparams, *, pn_number, tb=None, use_bf16=False):
    """x: (B, depth) f32. Returns (B, pn_number, out_features) f32."""
    B, depth = x.shape
    pn = pn_number
    wfc, bfc = kparams["wfc"], kparams["bfc"]   # (depth, pn*depth), (1, pn*depth)
    wh, bh = kparams["wh"], kparams["bh"]       # (n_hidden, g*depth, g*depth), (n_hidden, 1, g*depth)
    wo, bo = kparams["wo"], kparams["bo"]       # (g*depth, g*F), (1, g*F)

    assert wo.shape[0] % depth == 0
    g = wo.shape[0] // depth                    # points packed per matmul row
    out_features = wo.shape[1] // g
    assert pn % g == 0

    n_hidden = wh.shape[0]
    if n_hidden == 0:  # layers == 1: no hidden deconvs; pass harmless dummies.
        wh = jnp.zeros((1, g * depth, g * depth), jnp.float32)
        bh = jnp.zeros((1, 1, g * depth), jnp.float32)

    # Optional bf16 compute (MXU-native); biases / accumulation stay f32.
    cdt = jnp.bfloat16 if use_bf16 else jnp.float32
    wfc = wfc.astype(cdt)
    wh = wh.astype(cdt)
    wo = wo.astype(cdt)

    # ---- batch tile selection -------------------------------------------
    # Largest live activation per step is the fc output: tb*pn*depth f32.
    # Budget it at ~4 MiB -> portable across v5e/v6e (128 MiB) and v7x (64 MiB).
    if tb is None:
        act_budget = 4 * 1024 * 1024
        cap = max(1, act_budget // (pn * depth * 4))
        if B >= 16:
            # Keep >=2 grid steps so the "parallel" axis shards across v7x's 2 TCs.
            cap = min(cap, _round_up((B + 1) // 2, 8))
        if B <= cap:
            tb = B
        else:
            tb = max(8, (cap // 8) * 8)
            # TODO(synk): if cap < 8 (huge pn*depth) this exceeds the activation
            # budget; tile the pn axis instead of the batch axis in that regime.
    b_pad = _round_up(B, tb)
    if b_pad != B:
        x = jnp.concatenate([x, jnp.zeros((b_pad - B, depth), x.dtype)], axis=0)
    grid = (b_pad // tb,)

    rows_per_blk = tb * pn // g                 # packed rows per grid step
    gF = g * out_features

    # ---- VMEM budget / cost estimate ------------------------------------
    def _nbytes(a):
        return int(a.size) * a.dtype.itemsize

    weight_bytes = sum(_nbytes(a) for a in (wfc, bfc, wh, bh, wo, bo))
    est = (2 * weight_bytes                                   # pipelined weight bufs
           + 2 * (tb * depth + tb * pn * out_features) * 4    # double-buffered x/out
           + 3 * tb * pn * depth * 4)                         # live activations + margin
    vmem_limit = int(min(max(32 * 1024 * 1024, 2 * est), 48 * 1024 * 1024))

    flops = (2 * b_pad * depth * pn * depth
             + 2 * b_pad * pn * depth * (n_hidden * depth + out_features))
    bytes_accessed = _nbytes(x) + weight_bytes + b_pad * pn * out_features * 4
    cost = pl.CostEstimate(flops=flops, transcendentals=0,
                           bytes_accessed=bytes_accessed)

    # ---- kernel ----------------------------------------------------------
    def kernel(x_ref, wfc_ref, bfc_ref, wh_ref, bh_ref, wo_ref, bo_ref, out_ref):
        xb = x_ref[...].astype(cdt)                                     # (tb, depth)
        # fc: Linear + ReLU (fc weight pre-permuted -> column = n*depth + c)
        h = jnp.dot(xb, wfc_ref[...], preferred_element_type=jnp.float32)
        h = jnp.maximum(h + bfc_ref[...], 0.0)                          # (tb, pn*depth)
        # Pack g points per row: minor dim goes pn*depth -> g*depth (both
        # multiples of 128 when g > 1): lanes preserved, sublane-only regroup.
        h = h.reshape(rows_per_blk, g * depth)
        # (layers-1) x [ConvTranspose1d(depth, depth, 1) + ReLU] as block-diag matmuls
        for l in range(n_hidden):
            h = jnp.dot(h.astype(cdt), wh_ref[l], preferred_element_type=jnp.float32)
            h = jnp.maximum(h + bh_ref[l], 0.0)                         # (rows, g*depth)
        # final ConvTranspose1d(depth, out_features, 1), no ReLU
        y = jnp.dot(h.astype(cdt), wo_ref[...], preferred_element_type=jnp.float32)
        y = y + bo_ref[...]                                             # (rows, g*F)
        # Row-major flatten of y == row-major (tb, pn, F): store directly,
        # no epilogue relayout.
        out_ref[...] = y

    out_slab = pl.pallas_call(
        kernel,
        out_shape=jax.ShapeDtypeStruct((b_pad * pn // g, gF), jnp.float32),
        grid=grid,
        in_specs=[
            pl.BlockSpec((tb, depth), lambda i: (i, 0)),       # x
            pl.BlockSpec(wfc.shape, lambda i: (0, 0)),         # fc weight (permuted)
            pl.BlockSpec(bfc.shape, lambda i: (0, 0)),         # fc bias
            pl.BlockSpec(wh.shape, lambda i: (0, 0, 0)),       # hidden deconv weights (block-diag)
            pl.BlockSpec(bh.shape, lambda i: (0, 0, 0)),       # hidden deconv biases (tiled)
            pl.BlockSpec(wo.shape, lambda i: (0, 0)),          # final deconv weight (block-diag)
            pl.BlockSpec(bo.shape, lambda i: (0, 0)),          # final deconv bias (tiled)
        ],
        out_specs=pl.BlockSpec((rows_per_blk, gF), lambda i: (i, 0)),
        compiler_params=pltpu.CompilerParams(
            dimension_semantics=("parallel",),
            vmem_limit_bytes=vmem_limit,
        ),
        cost_estimate=cost,
    )(x, wfc, bfc, wh, bh, wo, bo)

    return out_slab.reshape(b_pad, pn, out_features)[:B]


def init_params(key, out_features, depth, layers, pn_number):
    """Deterministic synthetic params in the PyTorch layouts."""
    n_hidden = layers - 1
    ks = jax.random.split(key, 6)
    s = 0.1
    fc_w = s * jax.random.normal(ks[0], (depth * pn_number, depth), jnp.float32)  # Linear (out, in)
    fc_b = s * jax.random.normal(ks[1], (depth * pn_number,), jnp.float32)
    # ConvTranspose1d weight layout is (in_channels, out_channels, kernel=1)
    dc_w = s * jax.random.normal(ks[2], (max(n_hidden, 0), depth, depth, 1), jnp.float32)
    dc_b = s * jax.random.normal(ks[3], (max(n_hidden, 0), depth), jnp.float32)
    dcf_w = s * jax.random.normal(ks[4], (depth, out_features, 1), jnp.float32)
    dcf_b = s * jax.random.normal(ks[5], (out_features,), jnp.float32)
    return dict(fc_w=fc_w, fc_b=fc_b, dc_w=dc_w, dc_b=dc_b, dcf_w=dcf_w, dcf_b=dcf_b)


def to_kernel_params(pt, depth, pn_number):
    """Permute / block-diagonalize PyTorch-layout params for the packed kernel."""
    pn = pn_number
    g = _pack_factor(depth, pn)

    # PyTorch fc output index j = c*pn + n (then Unflatten -> [c, n]).  Kernel
    # wants column n*depth + c so the fc output reshapes to packed per-point,
    # channels-last rows with no lane relayout.
    wfc = pt["fc_w"].T.reshape(depth, depth, pn).transpose(0, 2, 1).reshape(depth, pn * depth)
    bfc = pt["fc_b"].reshape(depth, pn).T.reshape(1, pn * depth)

    def bdiag(w):
        # (din, dout) -> (g*din, g*dout) block-diagonal (g identical blocks).
        din, dout = w.shape
        return jnp.einsum("ab,ij->aibj", jnp.eye(g, dtype=w.dtype), w).reshape(g * din, g * dout)

    n_hidden = pt["dc_w"].shape[0]
    if n_hidden > 0:
        wh = jnp.stack([bdiag(pt["dc_w"][l, :, :, 0]) for l in range(n_hidden)])
        bh = jnp.stack([jnp.tile(pt["dc_b"][l], g)[None, :] for l in range(n_hidden)])
    else:
        wh = jnp.zeros((0, g * depth, g * depth), jnp.float32)
        bh = jnp.zeros((0, 1, g * depth), jnp.float32)

    wo = bdiag(pt["dcf_w"][:, :, 0])             # (g*depth, g*out_features)
    bo = jnp.tile(pt["dcf_b"], g)[None, :]       # (1, g*out_features)
    return dict(wfc=wfc, bfc=bfc, wh=wh, bh=bh, wo=wo, bo=bo)


def reference_forward(x, pt, depth, pn_number):
    """Pure-JAX reference mirroring the PyTorch forward exactly."""
    B = x.shape[0]
    h = jax.nn.relu(x @ pt["fc_w"].T + pt["fc_b"])          # Linear + ReLU
    h = h.reshape(B, depth, pn_number)                       # Unflatten(1, (depth, pn))
    for l in range(pt["dc_w"].shape[0]):
        w = pt["dc_w"][l, :, :, 0]                           # (in, out)
        h = jnp.einsum("bin,io->bon", h, w) + pt["dc_b"][l][None, :, None]
        h = jax.nn.relu(h)
    w = pt["dcf_w"][:, :, 0]
    h = jnp.einsum("bin,io->bon", h, w) + pt["dcf_b"][None, :, None]
    return jnp.transpose(h, (0, 2, 1))                       # (B, pn, out_features)


if __name__ == "__main__":
    # Keep both the kernel's MXU dots and the XLA reference at full f32
    # precision so the 1e-4 comparison is meaningful.
    jax.config.update("jax_default_matmul_precision", "highest")

    B, out_features, depth, layers, pn_number = 2, 4, 32, 3, 16

    key = jax.random.PRNGKey(0)
    x = jax.random.normal(key, (B, depth), jnp.float32)

    pt_params = init_params(jax.random.PRNGKey(42), out_features, depth, layers, pn_number)
    kparams = to_kernel_params(pt_params, depth, pn_number)

    out = point_cloud_decoder(x, kparams, pn_number=pn_number)
    out = jax.block_until_ready(out)

    ref = reference_forward(x, pt_params, depth, pn_number)
    assert out.shape == (B, pn_number, out_features), out.shape
    assert jnp.allclose(out, ref, rtol=1e-4, atol=1e-4), "mismatch vs reference"

    print("KERNEL_OK")
</pallas_src>

<mosaic_0001>
module attributes {stable_mosaic.version = 11 : i64} {
  func.func @kernel(%arg0: i32, %arg1: memref<2x32xf32, #tpu.memory_space<vmem>>, %arg2: memref<32x512xf32, #tpu.memory_space<vmem>>, %arg3: memref<1x512xf32, #tpu.memory_space<vmem>>, %arg4: memref<2x128x128xf32, #tpu.memory_space<vmem>>, %arg5: memref<2x1x128xf32, #tpu.memory_space<vmem>>, %arg6: memref<128x16xf32, #tpu.memory_space<vmem>>, %arg7: memref<1x16xf32, #tpu.memory_space<vmem>>, %arg8: memref<8x16xf32, #tpu.memory_space<vmem>>) attributes {dimension_semantics = [#tpu.dimension_semantics<parallel>], iteration_bounds = array<i64: 1>, scalar_prefetch = 0 : i64, scratch_operands = 0 : i64, tpu.core_type = #tpu.core_type<tc>, window_params = [{transform_indices = @transform_0, window_bounds = array<i64: 2, 32>}, {pipeline_mode = #tpu.pipeline_mode<synchronous>, transform_indices = @transform_1, window_bounds = array<i64: 32, 512>}, {pipeline_mode = #tpu.pipeline_mode<synchronous>, transform_indices = @transform_2, window_bounds = array<i64: 1, 512>}, {pipeline_mode = #tpu.pipeline_mode<synchronous>, transform_indices = @transform_3, window_bounds = array<i64: 2, 128, 128>}, {pipeline_mode = #tpu.pipeline_mode<synchronous>, transform_indices = @transform_4, window_bounds = array<i64: 2, 1, 128>}, {pipeline_mode = #tpu.pipeline_mode<synchronous>, transform_indices = @transform_5, window_bounds = array<i64: 128, 16>}, {pipeline_mode = #tpu.pipeline_mode<synchronous>, transform_indices = @transform_6, window_bounds = array<i64: 1, 16>}, {transform_indices = @transform_7, window_bounds = array<i64: 8, 16>}]} {
    %c0 = arith.constant 0 : index
    %c0_0 = arith.constant 0 : index
    %0 = vector.load %arg1[%c0, %c0_0] : memref<2x32xf32, #tpu.memory_space<vmem>>, vector<2x32xf32>
    %c0_1 = arith.constant 0 : index
    %c0_2 = arith.constant 0 : index
    %1 = vector.load %arg2[%c0_1, %c0_2] : memref<32x512xf32, #tpu.memory_space<vmem>>, vector<32x512xf32>
    %cst = arith.constant dense<0.000000e+00> : vector<2x512xf32>
    %2 = tpu.matmul %0, %1, %cst {dimension_numbers = #tpu.dot_dimension_numbers<[1], [0], [0], [1], [0, 0, 1, 1], [], []>, precision = #tpu.contract_precision<fp32>} : vector<2x32xf32>, vector<32x512xf32>, vector<2x512xf32> -> vector<2x512xf32>
    %c0_3 = arith.constant 0 : index
    %c0_4 = arith.constant 0 : index
    %3 = vector.load %arg3[%c0_3, %c0_4] : memref<1x512xf32, #tpu.memory_space<vmem>>, vector<1x512xf32>
    %4 = vector.broadcast %3 : vector<1x512xf32> to vector<2x512xf32>
    %5 = arith.addf %2, %4 : vector<2x512xf32>
    %cst_5 = arith.constant 0.000000e+00 : f32
    %6 = vector.broadcast %cst_5 : f32 to vector<2x512xf32>
    %7 = arith.maximumf %5, %6 : vector<2x512xf32>
    %8 = vector.shape_cast %7 : vector<2x512xf32> to vector<8x128xf32>
    %c0_6 = arith.constant 0 : index
    %c0_7 = arith.constant 0 : index
    %c0_8 = arith.constant 0 : index
    %9 = vector.load %arg4[%c0_6, %c0_7, %c0_8] : memref<2x128x128xf32, #tpu.memory_space<vmem>>, vector<1x128x128xf32>
    %10 = vector.shape_cast %9 : vector<1x128x128xf32> to vector<128x128xf32>
    %cst_9 = arith.constant dense<0.000000e+00> : vector<8x128xf32>
    %11 = tpu.matmul %8, %10, %cst_9 {dimension_numbers = #tpu.dot_dimension_numbers<[1], [0], [0], [1], [0, 0, 1, 1], [], []>, precision = #tpu.contract_precision<fp32>} : vector<8x128xf32>, vector<128x128xf32>, vector<8x128xf32> -> vector<8x128xf32>
    %c0_10 = arith.constant 0 : index
    %c0_11 = arith.constant 0 : index
    %c0_12 = arith.constant 0 : index
    %12 = vector.load %arg5[%c0_10, %c0_11, %c0_12] : memref<2x1x128xf32, #tpu.memory_space<vmem>>, vector<1x1x128xf32>
    %13 = vector.shape_cast %12 : vector<1x1x128xf32> to vector<1x128xf32>
    %14 = vector.broadcast %13 : vector<1x128xf32> to vector<8x128xf32>
    %15 = arith.addf %11, %14 : vector<8x128xf32>
    %cst_13 = arith.constant 0.000000e+00 : f32
    %16 = vector.broadcast %cst_13 : f32 to vector<8x128xf32>
    %17 = arith.maximumf %15, %16 : vector<8x128xf32>
    %c1 = arith.constant 1 : index
    %c0_14 = arith.constant 0 : index
    %c0_15 = arith.constant 0 : index
    %18 = vector.load %arg4[%c1, %c0_14, %c0_15] : memref<2x128x128xf32, #tpu.memory_space<vmem>>, vector<1x128x128xf32>
    %19 = vector.shape_cast %18 : vector<1x128x128xf32> to vector<128x128xf32>
    %cst_16 = arith.constant dense<0.000000e+00> : vector<8x128xf32>
    %20 = tpu.matmul %17, %19, %cst_16 {dimension_numbers = #tpu.dot_dimension_numbers<[1], [0], [0], [1], [0, 0, 1, 1], [], []>, precision = #tpu.contract_precision<fp32>} : vector<8x128xf32>, vector<128x128xf32>, vector<8x128xf32> -> vector<8x128xf32>
    %c1_17 = arith.constant 1 : index
    %c0_18 = arith.constant 0 : index
    %c0_19 = arith.constant 0 : index
    %21 = vector.load %arg5[%c1_17, %c0_18, %c0_19] : memref<2x1x128xf32, #tpu.memory_space<vmem>>, vector<1x1x128xf32>
    %22 = vector.shape_cast %21 : vector<1x1x128xf32> to vector<1x128xf32>
    %23 = vector.broadcast %22 : vector<1x128xf32> to vector<8x128xf32>
    %24 = arith.addf %20, %23 : vector<8x128xf32>
    %cst_20 = arith.constant 0.000000e+00 : f32
    %25 = vector.broadcast %cst_20 : f32 to vector<8x128xf32>
    %26 = arith.maximumf %24, %25 : vector<8x128xf32>
    %c0_21 = arith.constant 0 : index
    %c0_22 = arith.constant 0 : index
    %27 = vector.load %arg6[%c0_21, %c0_22] : memref<128x16xf32, #tpu.memory_space<vmem>>, vector<128x16xf32>
    %cst_23 = arith.constant dense<0.000000e+00> : vector<8x16xf32>
    %28 = tpu.matmul %26, %27, %cst_23 {dimension_numbers = #tpu.dot_dimension_numbers<[1], [0], [0], [1], [0, 0, 1, 1], [], []>, precision = #tpu.contract_precision<fp32>} : vector<8x128xf32>, vector<128x16xf32>, vector<8x16xf32> -> vector<8x16xf32>
    %c0_24 = arith.constant 0 : index
    %c0_25 = arith.constant 0 : index
    %29 = vector.load %arg7[%c0_24, %c0_25] : memref<1x16xf32, #tpu.memory_space<vmem>>, vector<1x16xf32>
    %30 = vector.broadcast %29 : vector<1x16xf32> to vector<8x16xf32>
    %31 = arith.addf %28, %30 : vector<8x16xf32>
    %c0_26 = arith.constant 0 : index
    %c0_27 = arith.constant 0 : index
    %32 = vector.load %arg8[%c0_26, %c0_27] : memref<8x16xf32, #tpu.memory_space<vmem>>, vector<8x16xf32>
    tpu.vector_store %arg8[%c0_26, %c0_27], %31 {strides = array<i32>} : memref<8x16xf32, #tpu.memory_space<vmem>>, vector<8x16xf32>,
    return
  }
  func.func @transform_0(%arg0: i32) -> (i32, i32) {
    %c0_i32 = arith.constant 0 : i32
    %c0_i32_0 = arith.constant 0 : i32
    return %arg0, %c0_i32 : i32, i32
  }
  func.func @transform_1(%arg0: i32) -> (i32, i32) {
    %c0_i32 = arith.constant 0 : i32
    %c0_i32_0 = arith.constant 0 : i32
    %c0_i32_1 = arith.constant 0 : i32
    return %c0_i32, %c0_i32_0 : i32, i32
  }
  func.func @transform_2(%arg0: i32) -> (i32, i32) {
    %c0_i32 = arith.constant 0 : i32
    %c0_i32_0 = arith.constant 0 : i32
    %c0_i32_1 = arith.constant 0 : i32
    return %c0_i32, %c0_i32_0 : i32, i32
  }
  func.func @transform_3(%arg0: i32) -> (i32, i32, i32) {
    %c0_i32 = arith.constant 0 : i32
    %c0_i32_0 = arith.constant 0 : i32
    %c0_i32_1 = arith.constant 0 : i32
    %c0_i32_2 = arith.constant 0 : i32
    return %c0_i32, %c0_i32_0, %c0_i32_1 : i32, i32, i32
  }
  func.func @transform_4(%arg0: i32) -> (i32, i32, i32) {
    %c0_i32 = arith.constant 0 : i32
    %c0_i32_0 = arith.constant 0 : i32
    %c0_i32_1 = arith.constant 0 : i32
    %c0_i32_2 = arith.constant 0 : i32
    return %c0_i32, %c0_i32_0, %c0_i32_1 : i32, i32, i32
  }
  func.func @transform_5(%arg0: i32) -> (i32, i32) {
    %c0_i32 = arith.constant 0 : i32
    %c0_i32_0 = arith.constant 0 : i32
    %c0_i32_1 = arith.constant 0 : i32
    return %c0_i32, %c0_i32_0 : i32, i32
  }
  func.func @transform_6(%arg0: i32) -> (i32, i32) {
    %c0_i32 = arith.constant 0 : i32
    %c0_i32_0 = arith.constant 0 : i32
    %c0_i32_1 = arith.constant 0 : i32
    return %c0_i32, %c0_i32_0 : i32, i32
  }
  func.func @transform_7(%arg0: i32) -> (i32, i32) {
    %c0_i32 = arith.constant 0 : i32
    %c0_i32_0 = arith.constant 0 : i32
    return %arg0, %c0_i32 : i32, i32
  }
}

</mosaic_0001>

<bundles_post_ra>
// kernel: tpu_custom_call.1
= control target key start
LH: loop header
LB: loop body
LE: loop exit
PB: predicated region body
PF: predicated region fallthrough
CT: control target
= control target key end

     0   :  { %12 = vsyncpa [#allocation3], 0  ;;  %s3030_s0 = inlined_call_operand.vmem [shape: f32[2,32], index: 0, kind: input, shape index: {}]   ;;  %s3031_s1 = inlined_call_operand.vmem [shape: f32[32,512], index: 1, kind: input, shape index: {}]   ;;  %s3032_s2 = inlined_call_operand.vmem [shape: f32[1,512], index: 2, kind: input, shape index: {}]   ;;  %s3033_s3 = inlined_call_operand.hbm [shape: f32[2,128,128], index: 3, kind: input, shape index: {}]   ;;  %s3034_s4 = inlined_call_operand.vmem [shape: f32[2,1,128], index: 4, kind: input, shape index: {}]   ;;  %s3035_s5 = inlined_call_operand.vmem [shape: f32[128,16], index: 5, kind: input, shape index: {}]   ;;  %s3036_s6 = inlined_call_operand.vmem [shape: f32[1,16], index: 6, kind: input, shape index: {}]   ;;  %s3037_s7 = inlined_call_operand.hbm [shape: f32[8,16], index: 7, kind: output, shape index: {}]  }
   0x1   :  { %13 = vsyncpa [#allocation4], 0  ;;  %s24_s26 = sshll.u32 %s3033_s3, 4  ;;  %s2003_s27 = smov [#allocation2]   ;;  %s25_s26 = int_to_ptr.hbm [resolvable:$true] %s24_s26 }
   0x2   :  { %s26_s28 = sshll.u32 %s2003_s27, 4  ;;  %s2004_s29 = smov 128   ;;  %s27_s28 = int_to_ptr.vmem [resolvable:$true] %s26_s28 }
   0x3   :  { %s2005_s30 = smov 8  }
   0x4   :  { %32 = dma.hbm_to_vmem [thread:$0]  %s25_s26, 4096, %s27_s28, [#allocation3], %s2004_s29, %s2004_s29, %s2005_s30  }
   0x5   :  { %1999 = dma.done.wait [#allocation3], 4096  }
   0x6   :  { %2000 = vsyncadd [#allocation3], 4294963200  ;;  %vm70_vm0 = vcmask 261120   ;;  %v56_v0 = vld [vmem:[%s3031_s1 + $0x60] sm:$0xff]  ;;  %v57_v10 = vld [vmem:[%s3031_s1 + $0x68] sm:$0xff]  ;;  %vm825_vm1 = vcmask 1041408  }
   0x7   :  { %v52_v1 = vld [vmem:[%s3031_s1 + $0x40] sm:$0xff]  ;;  %v2060_v3 = vand.u32 4294901760, %v56_v0  ;;  %v53_v11 = vld [vmem:[%s3031_s1 + $0x48] sm:$0xff]  ;;  %v2096_v18 = vand.u32 4294901760, %v57_v10  ;;  %v58_v41 = vld [vmem:[%s3031_s1 + $0x70] sm:$0xff]  ;;  %vm827_vm2 = vcmask 1045508  }
   0x8   :  { %v48_v2 = vld [vmem:[%s3031_s1 + $0x20] sm:$0xff]  ;;  %v2062_v4 = vand.u32 4294901760, %v52_v1  ;;  %v49_v16 = vld [vmem:[%s3031_s1 + $0x28] sm:$0xff]  ;;  %v2098_v19 = vand.u32 4294901760, %v53_v11  ;;  %v2152_v43 = vand.u32 4294901760, %v58_v41  ;;  %v54_v45 = vld [vmem:[%s3031_s1 + $0x50] sm:$0xff] }
   0x9   :  { %v2064_v5 = vand.u32 4294901760, %v48_v2  ;;  %v44_v6 = vld [vmem:[%s3031_s1] sm:$0xff]  ;;  %87 = vmatpush.msra.mxu2 %v2060_v3  ;;  %v116_v12 = vsub.f32 %v56_v0, %v2060_v3  ;;  %v45_v24 = vld [vmem:[%s3031_s1 + $0x8] sm:$0xff]  ;;  %v2111_v26 = vsub.f32 %v57_v10, %v2096_v18  ;;  %v2113_v27 = vand.u32 4294901760, %v49_v16  ;;  %372 = vmatpush.msra.mxu1 %v2096_v18  ;;  %v50_v48 = vld [vmem:[%s3031_s1 + $0x30] sm:$0xff]  ;;  %s2007_s24 = smov [#allocation5]  }
   0xa   :  { %v43_v7 = vld [vmem:[%s3030_s0] sm:$0x3]  ;;  %v2072_v8 = vand.u32 4294901760, %v44_v6  ;;  %v2085_v14 = vsub.f32 %v52_v1, %v2062_v4  ;;  %v2125_v32 = vsub.f32 %v53_v11, %v2098_v19  ;;  %v2127_v33 = vand.u32 4294901760, %v45_v24  ;;  %v46_v52 = vld [vmem:[%s3031_s1 + $0x10] sm:$0xff]  ;;  %s1930_s25 = sshll.u32 %s2007_s24, 4  ;;  %s1931_s25 = int_to_ptr.vmem [resolvable:$true] %s1930_s25 }
   0xb   :  { %v72_v9 = vsel %vm70_vm0, %v43_v7, 0  ;;  %v2088_v15 = vsub.f32 %v48_v2, %v2064_v5  ;;  %89 = vmatpush.msra.mxu2 %v2062_v4  ;;  %v117_v20 = vand.u32 4294901760, %v116_v12  ;;  %343 = vmatpush.msra.mxu0 %v2111_v26  ;;  %v2138_v38 = vsub.f32 %v49_v16, %v2113_v27  ;;  %s1932_s28 = sshll.u32 %s3037_s7, 4  ;;  %s1933_s28 = int_to_ptr.hbm [resolvable:$true] %s1932_s28 }
   0xc   :  { %v2082_v13 = vand.u32 4294901760, %v72_v9  ;;  %v2094_v17 = vsub.f32 %v44_v6, %v2072_v8  ;;  %v123_v22 = vand.u32 4294901760, %v2085_v14  ;;  %374 = vmatpush.msra.mxu1 %v2098_v19  ;;  %v2149_v42 = vsub.f32 %v45_v24, %v2127_v33 }
   0xd   :  { %v129_v23 = vand.u32 4294901760, %v2088_v15  ;;  %91 = vmatpush.msra.mxu2 %v2064_v5  ;;  %v118_v28 = vsub.f32 %v116_v12, %v117_v20  ;;  %346 = vmatpush.msra.mxu0 %v2125_v32  ;;  %v2160_v46 = vsub.f32 %v58_v41, %v2152_v43  ;;  %v2163_v47 = vand.u32 4294901760, %v54_v45 }
   0xe   :  { %v2102_v21 = vsub.f32 %v72_v9, %v2082_v13  ;;  %v135_v25 = vand.u32 4294901760, %v2094_v17  ;;  %v124_v30 = vsub.f32 %v2085_v14, %v123_v22  ;;  %376 = vmatpush.msra.mxu1 %v2113_v27  ;;  %v2175_v51 = vand.u32 4294901760, %v50_v48 }
   0xf   :  { %v130_v31 = vsub.f32 %v2088_v15, %v129_v23  ;;  %93 = vmatpush.msra.mxu2 %v2072_v8  ;;  %v119_v34 = vand.u32 4294901760, %v118_v28  ;;  %349 = vmatpush.msra.mxu0 %v2138_v38  ;;  %v2172_v49 = vsub.f32 %v54_v45, %v2163_v47  ;;  %v487_v50 = vand.u32 4294901760, %v2160_v46  ;;  %v849_v45 = vld [vmem:[#allocation2 + $0x68] sm:$0xff] }
  0x10   :  { %v2118_v29 = vand.u32 4294901760, %v2102_v21  ;;  %v125_v36 = vand.u32 4294901760, %v124_v30  ;;  %v136_v37 = vsub.f32 %v2094_v17, %v135_v25  ;;  %378 = vmatpush.msra.mxu1 %v2127_v33  ;;  %v2184_v54 = vsub.f32 %v50_v48, %v2175_v51  ;;  %v848_v48 = vld [vmem:[#allocation2 + $0x60] sm:$0xff] }
  0x11   :  { %158 = vmatpush.msrb.mxu2 %v116_v12  ;;  %120 = vmatpush.msra.mxu3 %v119_v34  ;;  %v131_v40 = vand.u32 4294901760, %v130_v31  ;;  %v488_v53 = vsub.f32 %v2160_v46, %v487_v50  ;;  %v493_v55 = vand.u32 4294901760, %v2172_v49  ;;  %v2187_v56 = vand.u32 4294901760, %v46_v52 }
  0x12   :  { %v97_v35 = vsub.f32 %v2102_v21, %v2118_v29  ;;  %v137_v44 = vand.u32 4294901760, %v136_v37  ;;  %352 = vmatpush.msra.mxu0 %v2149_v42  ;;  %382 = vmatmul.f32.vlgmr.msra.gmra.mxu1 %v2118_v29  ;;  %v499_v60 = vand.u32 4294901760, %v2184_v54  ;;  %v302_v0 = vand.u32 4294901760, %v2111_v26 }
  0x13   :  { %161 = vmatpush.msrb.mxu2 %v2085_v14  ;;  %126 = vmatpush.msra.mxu3 %v125_v36  ;;  %v489_v57 = vand.u32 4294901760, %v488_v53  ;;  %v494_v58 = vsub.f32 %v2172_v49, %v493_v55  ;;  %v2194_v59 = vsub.f32 %v46_v52, %v2187_v56  ;;  %v308_v6 = vand.u32 4294901760, %v2125_v32  ;;  %v847_v53 = vld [vmem:[#allocation2 + $0x58] sm:$0xff] }
  0x14   :  { %v2141_v39 = vand.u32 4294901760, %v97_v35  ;;  %355 = vmatmul.f32.vlgmr.msra.gmra.mxu0 %v2102_v21  ;;  %v500_v62 = vsub.f32 %v2184_v54, %v499_v60  ;;  %v303_v9 = vsub.f32 %v2111_v26, %v302_v0  ;;  %v314_v10 = vand.u32 4294901760, %v2138_v38 }
  0x15   :  { %164 = vmatpush.msrb.mxu2 %v2088_v15  ;;  %132 = vmatpush.msra.mxu3 %v131_v40  ;;  %v495_v61 = vand.u32 4294901760, %v494_v58  ;;  %v505_v63 = vand.u32 4294901760, %v2194_v59  ;;  %v309_v11 = vsub.f32 %v2125_v32, %v308_v6  ;;  %v320_v12 = vand.u32 4294901760, %v2149_v42 }
  0x16   :  { %99 = vmatmul.f32.vlgmr.msra.gmra.mxu2 %v2141_v39  ;;  %457 = vmatpush.msrb.mxu0 %v2152_v43  ;;  %v501_v1 = vand.u32 4294901760, %v500_v62  ;;  %v315_v14 = vsub.f32 %v2138_v38, %v314_v10  ;;  %v2310_v52 = vand.u32 4294901760, %v848_v48  ;;  %v2324_v58 = vand.u32 4294901760, %v847_v53 }
  0x17   :  { %167 = vmatpush.msrb.mxu2 %v2094_v17  ;;  %138 = vmatpush.msra.mxu3 %v137_v44  ;;  %v506_v2 = vsub.f32 %v2194_v59, %v505_v63  ;;  %v321_v15 = vsub.f32 %v2149_v42, %v320_v12  ;;  %vm829_vm3 = vcmask 1043456   ;;  %vm1923_vm4 = vcmask 130048  }
  0x18   :  { %140 = vmatmul.f32.vlgmr.msra.gmra.mxu3 %v2082_v13  ;;  %459 = vmatpush.msrb.mxu0 %v2163_v47  ;;  %v316_v16 = vand.u32 4294901760, %v315_v14 }
  0x19   :  { %216 = vmatpush.msra.mxu2 %v117_v20  ;;  %187 = vmatpush.msrb.mxu3 %v2060_v3  ;;  %v507_v7 = vand.u32 4294901760, %v506_v2  ;;  %v55_v20 = vld [vmem:[%s3031_s1 + $0x58] sm:$0xff] }
  0x1a   :  { %490 = vmatpush.msrb.mxu1 %v489_v57  ;;  %461 = vmatpush.msrb.mxu0 %v2175_v51  ;;  %v2320_v57 = vsub.f32 %v848_v48, %v2310_v52 }
  0x1b   :  { %220 = vmatpush.msra.mxu2 %v123_v22  ;;  %189 = vmatpush.msrb.mxu3 %v2062_v4  ;;  %v51_v22 = vld [vmem:[%s3031_s1 + $0x38] sm:$0xff] }
  0x1c   :  { %496 = vmatpush.msrb.mxu1 %v495_v61  ;;  %463 = vmatpush.msrb.mxu0 %v2187_v56  ;;  %v645_v26 = vand.u32 4294901760, %v51_v22  ;;  %v917_v62 = vand.u32 4294901760, %v2320_v57 }
  0x1d   :  { %224 = vmatpush.msra.mxu2 %v129_v23  ;;  %191 = vmatpush.msrb.mxu3 %v2064_v5  ;;  %v2247_v23 = vand.u32 4294901760, %v55_v20 }
  0x1e   :  { %170 = vmatmul.f32.vlgmr.msrb.gmra.mxu2 %v2102_v21  ;;  %502 = vmatpush.msrb.mxu1 %v501_v1  ;;  %v683_v31 = vsub.f32 %v51_v22, %v645_v26  ;;  %v845_v1 = vld [vmem:[#allocation2 + $0x48] sm:$0xff] }
  0x1f   :  { %228 = vmatpush.msra.mxu2 %v135_v25  ;;  %193 = vmatpush.msrb.mxu3 %v2072_v8  ;;  %v47_v25 = vld [vmem:[%s3031_s1 + $0x18] sm:$0xff]  ;;  %v677_v28 = vsub.f32 %v55_v20, %v2247_v23 }
  0x20   :  { %197 = vmatmul.f32.vlgmr.msrb.gmra.mxu3 %v2118_v29  ;;  %469 = vmatmul.f32.vlgmr.msrb.gmra.mxu0 %v2141_v39  ;;  %v647_v30 = vand.u32 4294901760, %v47_v25  ;;  %v684_v34 = vand.u32 4294901760, %v683_v31 }
  0x21   :  { %272 = vmatpush.msrb.mxu2 %v2096_v18  ;;  %247 = vmatpush.msra.mxu3 %v2060_v3  ;;  %v304_v3 = vand.u32 4294901760, %v303_v9  ;;  %v2345_v9 = vand.u32 4294901760, %v845_v1 }
  0x22   :  { %508 = vmatpush.msrb.mxu1 %v507_v7  ;;  %586 = vmatpush.msra.mxu0 %v487_v50  ;;  %v689_v32 = vsub.f32 %v47_v25, %v647_v30  ;;  %v685_v37 = vsub.f32 %v683_v31, %v684_v34 }
  0x23   :  { %274 = vmatpush.msrb.mxu2 %v2098_v19  ;;  %249 = vmatpush.msra.mxu3 %v2062_v4  ;;  %v310_v4 = vand.u32 4294901760, %v309_v11  ;;  %v844_v11 = vld [vmem:[#allocation2 + $0x40] sm:$0xff]  ;;  %v2352_v14 = vsub.f32 %v845_v1, %v2345_v9 }
  0x24   :  { %510 = vmatmul.f32.vlgmr.msrb.gmra.mxu1 %v2082_v13  ;;  %590 = vmatpush.msra.mxu0 %v493_v55  ;;  %v690_v35 = vand.u32 4294901760, %v689_v32  ;;  %v686_v41 = vand.u32 4294901760, %v685_v37 }
  0x25   :  { %276 = vmatpush.msrb.mxu2 %v2113_v27  ;;  %251 = vmatpush.msra.mxu3 %v2064_v5  ;;  %v59_v5 = vld [vmem:[%s3031_s1 + $0x78] sm:$0xff] }
  0x26   :  { %230 = vmatmul.f32.vlgmr.msra.gmra.mxu2 %v2082_v13  ;;  %617 = vmatpush.msra.mxu1 %v2152_v43  ;;  %v2236_v17 = vand.u32 4294901760, %v59_v5  ;;  %v691_v40 = vsub.f32 %v689_v32, %v690_v35 }
  0x27   :  { %278 = vmatpush.msrb.mxu2 %v2127_v33  ;;  %253 = vmatpush.msra.mxu3 %v2072_v8  ;;  %v322_v8 = vand.u32 4294901760, %v321_v15 }
  0x28   :  { %255 = vmatmul.f32.vlgmr.msra.gmra.mxu3 %v2082_v13  ;;  %594 = vmatpush.msra.mxu0 %v499_v60  ;;  %v671_v24 = vsub.f32 %v59_v5, %v2236_v17  ;;  %v692_v42 = vand.u32 4294901760, %v691_v40 }
  0x29   :  { %401 = vmatpush.msra.mxu2 %v302_v0  ;;  %305 = vmatpush.msrb.mxu3 %v304_v3  ;;  %v2335_v0 = vsub.f32 %v847_v53, %v2324_v58  ;;  %v838_v53 = vld [vmem:[#allocation2 + $0x10] sm:$0xff] }
  0x2a   :  { %619 = vmatpush.msra.mxu1 %v2163_v47  ;;  %598 = vmatpush.msra.mxu0 %v505_v63 }
  0x2b   :  { %405 = vmatpush.msra.mxu2 %v308_v6  ;;  %311 = vmatpush.msrb.mxu3 %v310_v4  ;;  %v918_v6 = vsub.f32 %v2320_v57, %v917_v62  ;;  %v2354_v4 = vand.u32 4294901760, %v844_v11 }
  0x2c   :  { %621 = vmatpush.msra.mxu1 %v2175_v51  ;;  %600 = vmatmul.f32.vlgmr.msra.gmra.mxu0 %v2082_v13 }
  0x2d   :  { %409 = vmatpush.msra.mxu2 %v314_v10  ;;  %317 = vmatpush.msrb.mxu3 %v316_v16  ;;  %v923_v10 = vand.u32 4294901760, %v2335_v0  ;;  %v843_v16 = vld [vmem:[#allocation2 + $0x38] sm:$0xff] }
  0x2e   :  { %284 = vmatmul.f32.vlgmr.msrb.gmra.mxu2 %v2141_v39  ;;  %623 = vmatpush.msra.mxu1 %v2187_v56  ;;  %v2369_v20 = vand.u32 4294901760, %v843_v16 }
  0x2f   :  { %413 = vmatpush.msra.mxu2 %v320_v12  ;;  %323 = vmatpush.msrb.mxu3 %v322_v8  ;;  %v919_v12 = vand.u32 4294901760, %v918_v6  ;;  %v924_v15 = vsub.f32 %v2335_v0, %v923_v10  ;;  %v935_v8 = vand.u32 4294901760, %v2352_v14 }
  0x30   :  { %325 = vmatmul.f32.vlgmr.msrb.gmra.mxu3 %v2082_v13  ;;  %713 = vmatpush.msrb.mxu0 %v671_v24 }
  0x31   :  { %528 = vmatpush.msrb.mxu2 %v2160_v46  ;;  %432 = vmatpush.msra.mxu3 %v2096_v18  ;;  %v672_v18 = vand.u32 4294901760, %v671_v24  ;;  %v925_v22 = vand.u32 4294901760, %v924_v15  ;;  %v936_v25 = vsub.f32 %v2352_v14, %v935_v8 }
  0x32   :  { %625 = vmatmul.f32.vlgmr.msra.gmra.mxu1 %v2082_v13  ;;  %716 = vmatpush.msrb.mxu0 %v677_v28 }
  0x33   :  { %531 = vmatpush.msrb.mxu2 %v2172_v49  ;;  %434 = vmatpush.msra.mxu3 %v2098_v19  ;;  %v678_v19 = vand.u32 4294901760, %v677_v28 }
  0x34   :  { %742 = vmatpush.msrb.mxu1 %v2236_v17  ;;  %719 = vmatpush.msrb.mxu0 %v683_v31  ;;  %v937_v31 = vand.u32 4294901760, %v936_v25 }
  0x35   :  { %534 = vmatpush.msrb.mxu2 %v2184_v54  ;;  %436 = vmatpush.msra.mxu3 %v2113_v27  ;;  %v673_v27 = vsub.f32 %v671_v24, %v672_v18 }
  0x36   :  { %415 = vmatmul.f32.vlgmr.msra.gmra.mxu2 %v2082_v13  ;;  %744 = vmatpush.msrb.mxu1 %v2247_v23 }
  0x37   :  { %537 = vmatpush.msrb.mxu2 %v2194_v59  ;;  %438 = vmatpush.msra.mxu3 %v2127_v33  ;;  %v679_v33 = vsub.f32 %v677_v28, %v678_v19  ;;  %v674_v36 = vand.u32 4294901760, %v673_v27  ;;  %v846_v59 = vld [vmem:[#allocation2 + $0x50] sm:$0xff]  ;;  %v2379_v28 = vsub.f32 %v843_v16, %v2369_v20 }
  0x38   :  { %440 = vmatmul.f32.vlgmr.msra.gmra.mxu3 %v2082_v13  ;;  %722 = vmatpush.msrb.mxu0 %v689_v32  ;;  %v2331_v63 = vand.u32 4294901760, %v846_v59 }
  0x39   :  { %642 = vmatpush.msra.mxu2 %v2236_v17  ;;  %557 = vmatpush.msrb.mxu3 %v2152_v43  ;;  %v680_v38 = vand.u32 4294901760, %v679_v33  ;;  %v947_v32 = vand.u32 4294901760, %v2379_v28 }
  0x3a   :  { %746 = vmatpush.msrb.mxu1 %v645_v26  ;;  %725 = vmatmul.f32.vlgmr.msrb.gmra.mxu0 %v2102_v21  ;;  %v2343_v7 = vsub.f32 %v846_v59, %v2331_v63 }
  0x3b   :  { %644 = vmatpush.msra.mxu2 %v2247_v23  ;;  %559 = vmatpush.msrb.mxu3 %v2163_v47  ;;  %v948_v37 = vsub.f32 %v2379_v28, %v947_v32 }
  0x3c   :  { %748 = vmatpush.msrb.mxu1 %v647_v30  ;;  %v929_v3 = vand.u32 4294901760, %v2343_v7 }
  0x3d   :  { %646 = vmatpush.msra.mxu2 %v645_v26  ;;  %561 = vmatpush.msrb.mxu3 %v2175_v51 }
  0x3e   :  { %540 = vmatmul.f32.vlgmr.msrb.gmra.mxu2 %v2102_v21  ;;  %752 = vmatmul.f32.vlgmr.msrb.gmra.mxu1 %v2118_v29  ;;  %v851_v21 = vld [vmem:[#allocation2 + $0x78] sm:$0xff]  ;;  %v930_v5 = vsub.f32 %v2343_v7, %v929_v3 }
  0x3f   :  { %648 = vmatpush.msra.mxu2 %v647_v30  ;;  %563 = vmatpush.msrb.mxu3 %v2187_v56 }
  0x40   :  { %567 = vmatmul.f32.vlgmr.msrb.gmra.mxu3 %v2118_v29  ;;  %v2285_v29 = vand.u32 4294901760, %v851_v21  ;;  %v931_v24 = vand.u32 4294901760, %v930_v5 }
  0x41   :  { %771 = vmatpush.msrb.mxu2 %v672_v18  ;;  %675 = vmatpush.msra.mxu3 %v674_v36  ;;  %v841_v18 = vld [vmem:[#allocation2 + $0x28] sm:$0xff] }
  0x42   :  { %v2288_v43 = vsub.f32 %v851_v21, %v2285_v29  ;;  %857 = vmatpush.msra.mxu0 %v2285_v29  ;;  %v2389_v27 = vand.u32 4294901760, %v841_v18  ;;  %v949_v21 = vand.u32 4294901760, %v948_v37 }
  0x43   :  { %775 = vmatpush.msrb.mxu2 %v678_v19  ;;  %681 = vmatpush.msra.mxu3 %v680_v38 }
  0x44   :  { %v899_v46 = vand.u32 4294901760, %v2288_v43  ;;  %v2403_v38 = vsub.f32 %v841_v18, %v2389_v27 }
  0x45   :  { %779 = vmatpush.msrb.mxu2 %v684_v34  ;;  %687 = vmatpush.msra.mxu3 %v686_v41 }
  0x46   :  { %654 = vmatmul.f32.vlgmr.msra.gmra.mxu2 %v2141_v39  ;;  %v850_v39 = vld [vmem:[#allocation2 + $0x70] sm:$0xff]  ;;  %v900_v49 = vsub.f32 %v2288_v43, %v899_v46 }
  0x47   :  { %783 = vmatpush.msrb.mxu2 %v690_v35  ;;  %693 = vmatpush.msra.mxu3 %v692_v42  ;;  %v2290_v44 = vand.u32 4294901760, %v850_v39  ;;  %v840_v35 = vld [vmem:[#allocation2 + $0x20] sm:$0xff]  ;;  %v839_v42 = vld [vmem:[#allocation2 + $0x18] sm:$0xff] }
  0x48   :  { %695 = vmatmul.f32.vlgmr.msra.gmra.mxu3 %v2082_v13  ;;  %v901_v54 = vand.u32 4294901760, %v900_v49  ;;  %v2408_v41 = vand.u32 4294901760, %v840_v35 }
  0x49   :  { %802 = vmatpush.msrb.mxu3 %v2236_v17  ;;  %v2296_v47 = vsub.f32 %v850_v39, %v2290_v44  ;;  %859 = vmatpush.msra.mxu0 %v2290_v44  ;;  %v2367_v17 = vsub.f32 %v844_v11, %v2354_v4  ;;  %v959_v39 = vand.u32 4294901760, %v2403_v38 }
  0x4a   :  { %1000 = vmatpush.msra.mxu2 %v2288_v43  ;;  %902 = vmatpush.msra.mxu1 %v901_v54  ;;  %v2420_v49 = vsub.f32 %v840_v35, %v2408_v41 }
  0x4b   :  { %804 = vmatpush.msrb.mxu3 %v2247_v23  ;;  %v905_v50 = vand.u32 4294901760, %v2296_v47  ;;  %v842_v23 = vld [vmem:[#allocation2 + $0x30] sm:$0xff] }
  0x4c   :  { %1003 = vmatpush.msra.mxu2 %v2296_v47  ;;  %v965_v1 = vand.u32 4294901760, %v2420_v49 }
  0x4d   :  { %806 = vmatpush.msrb.mxu3 %v645_v26  ;;  %v906_v55 = vsub.f32 %v2296_v47, %v905_v50  ;;  %v941_v26 = vand.u32 4294901760, %v2367_v17 }
  0x4e   :  { %785 = vmatmul.f32.vlgmr.msrb.gmra.mxu2 %v2082_v13  ;;  %v966_v16 = vsub.f32 %v2420_v49, %v965_v1 }
  0x4f   :  { %808 = vmatpush.msrb.mxu3 %v647_v30  ;;  %v907_v60 = vand.u32 4294901760, %v906_v55  ;;  %v2382_v30 = vand.u32 4294901760, %v842_v23  ;;  %v942_v19 = vsub.f32 %v2367_v17, %v941_v26  ;;  %v960_v55 = vsub.f32 %v2403_v38, %v959_v39 }
  0x50   :  { %810 = vmatmul.f32.vlgmr.msrb.gmra.mxu3 %v2082_v13  ;;  %v2298_v13 = vand.u32 4294901760, %v849_v45  ;;  %v967_v18 = vand.u32 4294901760, %v966_v16 }
  0x51   :  { %1053 = vmatpush.msra.mxu3 %v2285_v29  ;;  %908 = vmatpush.msra.mxu1 %v907_v60  ;;  %v2396_v33 = vsub.f32 %v842_v23, %v2382_v30  ;;  %v943_v36 = vand.u32 4294901760, %v942_v19  ;;  %v2431_v60 = vand.u32 4294901760, %v838_v53  ;;  %v961_v6 = vand.u32 4294901760, %v960_v55 }
  0x52   :  { %v2308_v51 = vsub.f32 %v849_v45, %v2298_v13  ;;  %861 = vmatpush.msra.mxu0 %v2298_v13  ;;  %v2412_v45 = vand.u32 4294901760, %v839_v42 }
  0x53   :  { %1055 = vmatpush.msra.mxu3 %v2290_v44  ;;  %v953_v40 = vand.u32 4294901760, %v2396_v33 }
  0x54   :  { %v911_v56 = vand.u32 4294901760, %v2308_v51  ;;  %863 = vmatpush.msra.mxu0 %v2310_v52  ;;  %1006 = vmatpush.msra.mxu2 %v2308_v51  ;;  %v2429_v59 = vsub.f32 %v839_v42, %v2412_v45 }
  0x55   :  { %1057 = vmatpush.msra.mxu3 %v2298_v13  ;;  %v954_v48 = vsub.f32 %v2396_v33, %v953_v40 }
  0x56   :  { %v912_v61 = vsub.f32 %v2308_v51, %v911_v56  ;;  %1009 = vmatpush.msra.mxu2 %v2320_v57  ;;  %865 = vmatpush.msra.mxu0 %v2324_v58  ;;  %v971_v11 = vand.u32 4294901760, %v2429_v59 }
  0x57   :  { %1059 = vmatpush.msra.mxu3 %v2310_v52 }
  0x58   :  { %v913_v2 = vand.u32 4294901760, %v912_v61  ;;  %867 = vmatpush.msra.mxu0 %v2331_v63  ;;  %1012 = vmatpush.msra.mxu2 %v2335_v0  ;;  %v955_v61 = vand.u32 4294901760, %v954_v48  ;;  %v972_v23 = vsub.f32 %v2429_v59, %v971_v11 }
  0x59   :  { %1061 = vmatpush.msra.mxu3 %v2324_v58 }
  0x5a   :  { %914 = vmatpush.msra.mxu1 %v913_v2  ;;  %869 = vmatpush.msra.mxu0 %v2345_v9  ;;  %v837_v2 = vld [vmem:[#allocation2 + $0x8] sm:$0xff]  ;;  %v973_v19 = vand.u32 4294901760, %v972_v23 }
  0x5b   :  { %1063 = vmatpush.msra.mxu3 %v2331_v63  ;;  %1015 = vmatpush.msra.mxu2 %v2343_v7  ;;  %v2448_v5 = vand.u32 4294901760, %v837_v2 }
  0x5c   :  { %920 = vmatpush.msra.mxu1 %v919_v12  ;;  %871 = vmatpush.msra.mxu0 %v2354_v4  ;;  %v2439_v12 = vsub.f32 %v838_v53, %v2431_v60 }
  0x5d   :  { %1065 = vmatpush.msra.mxu3 %v2345_v9  ;;  %1018 = vmatpush.msra.mxu2 %v2352_v14 }
  0x5e   :  { %926 = vmatpush.msra.mxu1 %v925_v22  ;;  %873 = vmatpush.msra.mxu0 %v2369_v20  ;;  %v836_v22 = vld [vmem:[#allocation2] sm:$0xff] }
  0x5f   :  { %1067 = vmatpush.msra.mxu3 %v2354_v4  ;;  %1021 = vmatpush.msra.mxu2 %v2367_v17  ;;  %v2455_v25 = vand.u32 4294901760, %v836_v22 }
  0x60   :  { %932 = vmatpush.msra.mxu1 %v931_v24  ;;  %875 = vmatpush.msra.mxu0 %v2382_v30  ;;  %v977_v24 = vand.u32 4294901760, %v2439_v12 }
  0x61   :  { %1069 = vmatpush.msra.mxu3 %v2369_v20  ;;  %1024 = vmatpush.msra.mxu2 %v2379_v28 }
  0x62   :  { %938 = vmatpush.msra.mxu1 %v937_v31  ;;  %877 = vmatpush.msra.mxu0 %v2389_v27  ;;  %v2460_v31 = vsub.f32 %v837_v2, %v2448_v5  ;;  %v978_v35 = vsub.f32 %v2439_v12, %v977_v24 }
  0x63   :  { %1071 = vmatpush.msra.mxu3 %v2382_v30  ;;  %1027 = vmatpush.msra.mxu2 %v2396_v33 }
  0x64   :  { %944 = vmatpush.msra.mxu1 %v943_v36  ;;  %879 = vmatpush.msra.mxu0 %v2408_v41  ;;  %v2467_v36 = vsub.f32 %v836_v22, %v2455_v25  ;;  %v983_v37 = vand.u32 4294901760, %v2460_v31 }
  0x65   :  { %1073 = vmatpush.msra.mxu3 %v2389_v27  ;;  %1030 = vmatpush.msra.mxu2 %v2403_v38 }
  0x66   :  { %950 = vmatpush.msra.mxu1 %v949_v21  ;;  %881 = vmatpush.msra.mxu0 %v2412_v45  ;;  %v979_v21 = vand.u32 4294901760, %v978_v35  ;;  %v989_v48 = vand.u32 4294901760, %v2467_v36  ;;  %v984_v53 = vsub.f32 %v2460_v31, %v983_v37 }
  0x67   :  { %1075 = vmatpush.msra.mxu3 %v2408_v41  ;;  %1033 = vmatpush.msra.mxu2 %v2420_v49 }
  0x68   :  { %956 = vmatpush.msra.mxu1 %v955_v61  ;;  %883 = vmatpush.msra.mxu0 %v2431_v60  ;;  %v990_v55 = vsub.f32 %v2467_v36, %v989_v48  ;;  %v985_v2 = vand.u32 4294901760, %v984_v53 }
  0x69   :  { %1077 = vmatpush.msra.mxu3 %v2412_v45  ;;  %1036 = vmatpush.msra.mxu2 %v2429_v59 }
  0x6a   :  { %962 = vmatpush.msra.mxu1 %v961_v6  ;;  %885 = vmatpush.msra.mxu0 %v2448_v5  ;;  %v991_v43 = vand.u32 4294901760, %v990_v55 }
  0x6b   :  { %1079 = vmatpush.msra.mxu3 %v2431_v60  ;;  %1039 = vmatpush.msra.mxu2 %v2439_v12 }
  0x6c   :  { %968 = vmatpush.msra.mxu1 %v967_v18  ;;  %887 = vmatpush.msra.mxu0 %v2455_v25  ;;  %v1212_v18 = vld [vmem:[#allocation2 + $0xe8] sm:$0xff] }
  0x6d   :  { %1081 = vmatpush.msra.mxu3 %v2448_v5  ;;  %1042 = vmatpush.msra.mxu2 %v2460_v31  ;;  %v2006_v31 = vmov 1966171168  }
  0x6e   :  { %1094 = vmatpush.msrb.mxu0 %v899_v46  ;;  %974 = vmatpush.msra.mxu1 %v973_v19  ;;  %v833_v19 = vunpack.c.l.s4 %v2006_v31 }
  0x6f   :  { %1083 = vmatpush.msra.mxu3 %v2455_v25  ;;  %1045 = vmatpush.msra.mxu2 %v2467_v36 }
  0x70   :  { %1098 = vmatpush.msrb.mxu0 %v905_v50  ;;  %980 = vmatpush.msra.mxu1 %v979_v21  ;;  %v1210_v21 = vld [vmem:[#allocation2 + $0xd8] sm:$0xff] }
  0x72   :  { %1102 = vmatpush.msrb.mxu0 %v911_v56  ;;  %986 = vmatpush.msra.mxu1 %v985_v2 }
  0x74   :  { %1106 = vmatpush.msrb.mxu0 %v917_v62  ;;  %992 = vmatpush.msra.mxu1 %v991_v43  ;;  %v1208_v43 = vld [vmem:[#allocation2 + $0xc8] sm:$0xff] }
  0x76   :  { %1161 = vmatpush.msrb.mxu1 %v2285_v29  ;;  %1110 = vmatpush.msrb.mxu0 %v923_v10  ;;  %v60_v29 = vld [vmem:[%s3032_s2] sm:$0xf] }
  0x77   :  { %v63_v51 = vperm.slane %v60_v29, 1  ;;  %v62_v57 = vperm.slane %v60_v29, 0 }
  0x78   :  { %1163 = vmatpush.msrb.mxu1 %v2290_v44  ;;  %1114 = vmatpush.msrb.mxu0 %v929_v3 }
  0x7a   :  { %1165 = vmatpush.msrb.mxu1 %v2298_v13  ;;  %1118 = vmatpush.msrb.mxu0 %v935_v8  ;;  %v64_v13 = vperm.slane %v60_v29, 2 }
  0x7c   :  { %1167 = vmatpush.msrb.mxu1 %v2310_v52  ;;  %1122 = vmatpush.msrb.mxu0 %v941_v26 }
  0x7e   :  { %1169 = vmatpush.msrb.mxu1 %v2324_v58  ;;  %1126 = vmatpush.msrb.mxu0 %v947_v32 }
  0x80   :  { %1171 = vmatpush.msrb.mxu1 %v2331_v63  ;;  %1130 = vmatpush.msrb.mxu0 %v953_v40 }
  0x82   :  { %1173 = vmatpush.msrb.mxu1 %v2345_v9  ;;  %1134 = vmatpush.msrb.mxu0 %v959_v39 }
  0x84   :  { %1175 = vmatpush.msrb.mxu1 %v2354_v4  ;;  %1138 = vmatpush.msrb.mxu0 %v965_v1 }
  0x86   :  { %1177 = vmatpush.msrb.mxu1 %v2369_v20  ;;  %1142 = vmatpush.msrb.mxu0 %v971_v11 }
  0x88   :  { %1179 = vmatpush.msrb.mxu1 %v2382_v30  ;;  %1146 = vmatpush.msrb.mxu0 %v977_v24  ;;  %v1214_v24 = vld [vmem:[#allocation2 + $0xf8] sm:$0xff] }
  0x89   :  { %v2541_v35 = vand.u32 4294901760, %v1214_v24 }
  0x8a   :  { %1181 = vmatpush.msrb.mxu1 %v2389_v27  ;;  %1150 = vmatpush.msrb.mxu0 %v983_v37  ;;  %v2545_v37 = vand.u32 4294901760, %v1212_v18 }
  0x8b   :  { %1221 = vmatpush.msrb.mxu2 %v2541_v35 }
  0x8c   :  { %1183 = vmatpush.msrb.mxu1 %v2408_v41  ;;  %1154 = vmatpush.msrb.mxu0 %v989_v48  ;;  %v1209_v48 = vld [vmem:[#allocation2 + $0xd0] sm:$0xff] }
  0x8d   :  { %v2551_v2 = vand.u32 4294901760, %v1209_v48 }
  0x8e   :  { %1185 = vmatpush.msrb.mxu1 %v2412_v45 }
  0x8f   :  { %v383_v50 = vpop.f32.mrf.mxu1 }
  0x90   :  { %1187 = vmatpush.msrb.mxu1 %v2431_v60 }
  0x91   :  { %v356_v6 = vpop.f32.mrf.mxu0 }
  0x92   :  { %1189 = vmatpush.msrb.mxu1 %v2448_v5 }
  0x94   :  { %1191 = vmatpush.msrb.mxu1 %v2455_v25  ;;  %v1213_v25 = vld [vmem:[#allocation2 + $0xf0] sm:$0xff] }
  0x95   :  { %v2543_v36 = vand.u32 4294901760, %v1213_v25 }
  0x97   :  { %1223 = vmatpush.msrb.mxu2 %v2543_v36 }
  0x99   :  { %v2393_v34 = vpop.f32.mrf.mxu2  ;;  %1225 = vmatpush.msrb.mxu2 %v2545_v37 }
  0x9a   :  { %v101_v63 = vadd.f32 %v2393_v34, %v62_v57  ;;  %v65_v34 = vperm.slane %v60_v29, 3  ;;  %v2563_v29 = vand.u32 4294901760, %v1208_v43 }
  0x9b   :  { %v2423_v54 = vpop.f32.mrf.mxu3 }
  0x9c   :  { %v142_v14 = vadd.f32 %v2423_v54, %v101_v63 }
  0x9d   :  { %v470_v56 = vpop.f32.mrf.mxu0 }
  0x9e   :  { %v471_v58 = vadd.f32 %v470_v56, %v64_v13  ;;  %v2572_v56 = vsub.f32 %v1209_v48, %v2551_v2 }
  0xa1   :  { %v2443_v15 = vpop.f32.mrf.mxu2  ;;  %v511_v0 = vpop.f32.mrf.mxu1 }
  0xa2   :  { %v512_v10 = vadd.f32 %v511_v0, %v471_v58  ;;  %v172_v20 = vadd.f32 %v2443_v15, %v142_v14 }
  0xa3   :  { %v2473_v42 = vpop.f32.mrf.mxu3 }
  0xa4   :  { %v199_v33 = vadd.f32 %v2473_v42, %v172_v20  ;;  %v1211_v42 = vld [vmem:[#allocation2 + $0xe0] sm:$0xff]  ;;  %v1293_v20 = vand.u32 4294901760, %v2572_v56 }
  0xa5   :  { %v2547_v55 = vand.u32 4294901760, %v1211_v42 }
  0xa7   :  { %1227 = vmatpush.msrb.mxu2 %v2547_v55 }
  0xa9   :  { %v2485_v61 = vpop.f32.mrf.mxu2  ;;  %v601_v17 = vpop.f32.mrf.mxu0 }
  0xaa   :  { %v232_v39 = vadd.f32 %v2485_v61, %v199_v33  ;;  %v2549_v61 = vand.u32 4294901760, %v1210_v21  ;;  %v1205_v33 = vld [vmem:[#allocation2 + $0xb0] sm:$0xff] }
  0xab   :  { %v2491_v46 = vpop.f32.mrf.mxu3 }
  0xac   :  { %v2538_v49 = vadd.f32 %v2491_v46, %v232_v39  ;;  %v2569_v13 = vsub.f32 %v1210_v21, %v2549_v61  ;;  %1229 = vmatpush.msrb.mxu2 %v2549_v61 }
  0xae   :  { %v814_v15 = vmax.f32 %v2538_v49, 0.0  ;;  %v1203_v49 = vld [vmem:[#allocation2 + $0xa0] sm:$0xff]  ;;  %1231 = vmatpush.msrb.mxu2 %v2551_v2 }
  0xaf   :  { %v626_v28 = vpop.f32.mrf.mxu1 }
  0xb0   :  { %1233 = vmatpush.msrb.mxu2 %v2563_v29 }
  0xb1   :  { %v285_v47 = vpop.f32.mrf.mxu2 }
  0xb2   :  { %v286_v62 = vadd.f32 %v285_v47, %v63_v51  ;;  %v2557_v47 = vsub.f32 %v1213_v25, %v2543_v36  ;;  %v2566_v51 = vsub.f32 %v1211_v42, %v2547_v55  ;;  %v1201_v25 = vld [vmem:[#allocation2 + $0x90] sm:$0xff] }
  0xb3   :  { %v326_v44 = vpop.f32.mrf.mxu3 }
  0xb4   :  { %v327_v9 = vadd.f32 %v326_v44, %v286_v62  ;;  %v1269_v62 = vand.u32 4294901760, %v2557_v47  ;;  %v1281_v63 = vand.u32 4294901760, %v2566_v51 }
  0xb6   :  { %v357_v4 = vadd.f32 %v356_v6, %v327_v9  ;;  %v2554_v6 = vsub.f32 %v1214_v24, %v2541_v35  ;;  %v2581_v9 = vsub.f32 %v1208_v43, %v2563_v29  ;;  %v2624_v24 = vand.u32 4294901760, %v1203_v49 }
  0xb7   :  { %v726_v54 = vpop.f32.mrf.mxu0 }
  0xb8   :  { %v384_v30 = vadd.f32 %v383_v50, %v357_v4  ;;  %v2560_v50 = vsub.f32 %v1212_v18, %v2545_v37  ;;  %v1263_v57 = vand.u32 4294901760, %v2554_v6  ;;  %v1299_v39 = vand.u32 4294901760, %v2581_v9 }
  0xb9   :  { %v416_v52 = vpop.f32.mrf.mxu2 }
  0xba   :  { %v417_v38 = vadd.f32 %v416_v52, %v384_v30  ;;  %v1275_v58 = vand.u32 4294901760, %v2560_v50 }
  0xbb   :  { %v441_v7 = vpop.f32.mrf.mxu3  ;;  %v753_v12 = vpop.f32.mrf.mxu1 }
  0xbc   :  { %v442_v59 = vadd.f32 %v441_v7, %v417_v38  ;;  %v1287_v7 = vand.u32 4294901760, %v2569_v13  ;;  %v1276_v14 = vsub.f32 %v2560_v50, %v1275_v58 }
  0xbe   :  { %v815_v5 = vmax.f32 %v442_v59, 0.0 }
  0xc0   :  { %v822_v52 = vrot.slane %v815_v5, 6 }
  0xc1   :  { %v541_v3 = vpop.f32.mrf.mxu2 }
  0xc2   :  { %v542_v8 = vadd.f32 %v541_v3, %v512_v10  ;;  %v1264_v10 = vsub.f32 %v2554_v6, %v1263_v57  ;;  %v1270_v3 = vsub.f32 %v2557_v47, %v1269_v62  ;;  %v826_v38 = vsel %vm825_vm1, %v814_v15, %v822_v52 }
  0xc3   :  { %v568_v26 = vpop.f32.mrf.mxu3 }
  0xc4   :  { %v569_v32 = vadd.f32 %v568_v26, %v542_v8  ;;  %v1207_v26 = vld [vmem:[#allocation2 + $0xc0] sm:$0xff]  ;;  %v1265_v30 = vand.u32 4294901760, %v1264_v10 }
  0xc5   :  { %v2605_v59 = vand.u32 4294901760, %v1207_v26 }
  0xc6   :  { %v602_v40 = vadd.f32 %v601_v17, %v569_v32  ;;  %v834_v17 = vunpack.c.0.s8 %v833_v19  ;;  %v1271_v32 = vand.u32 4294901760, %v1270_v3  ;;  %1266 = vmatpush.msrb.mxu3 %v1265_v30  ;;  %v1300_v19 = vsub.f32 %v2581_v9, %v1299_v39 }
  0xc7   :  { %1235 = vmatpush.msrb.mxu2 %v2605_v59  ;;  %v2652_v3 = vsub.f32 %v1203_v49, %v2624_v24 }
  0xc8   :  { %v627_v1 = vadd.f32 %v626_v28, %v602_v40  ;;  %v1206_v28 = vld [vmem:[#allocation2 + $0xb8] sm:$0xff]  ;;  %1272 = vmatpush.msrb.mxu3 %v1271_v32 }
  0xc9   :  { %v655_v27 = vpop.f32.mrf.mxu2 }
  0xca   :  { %v656_v41 = vadd.f32 %v655_v27, %v65_v34  ;;  %v816_v22 = vmax.f32 %v627_v1, 0.0  ;;  %v1282_v34 = vsub.f32 %v2566_v51, %v1281_v63  ;;  %v1204_v27 = vld [vmem:[#allocation2 + $0xa8] sm:$0xff]  ;;  %v2608_v1 = vand.u32 4294901760, %v1206_v28 }
  0xcb   :  { %v696_v45 = vpop.f32.mrf.mxu3  ;;  %v2615_v15 = vand.u32 4294901760, %v1204_v27 }
  0xcc   :  { %v697_v11 = vadd.f32 %v696_v45, %v656_v41  ;;  %v823_v4 = vrot.slane %v816_v22, 4  ;;  %v1288_v41 = vsub.f32 %v2569_v13, %v1287_v7  ;;  %v1283_v5 = vand.u32 4294901760, %v1282_v34  ;;  %1237 = vmatpush.msrb.mxu2 %v2608_v1 }
  0xcd   :  { %v2618_v22 = vsub.f32 %v1207_v26, %v2605_v59 }
  0xce   :  { %v727_v60 = vadd.f32 %v726_v54, %v697_v11  ;;  %v1277_v54 = vand.u32 4294901760, %v1276_v14  ;;  %v1289_v31 = vand.u32 4294901760, %v1288_v41 }
  0xcf   :  { %v1305_v21 = vand.u32 4294901760, %v2618_v22 }
  0xd0   :  { %v754_v23 = vadd.f32 %v753_v12, %v727_v60  ;;  %v1294_v12 = vsub.f32 %v2572_v56, %v1293_v20  ;;  %v2613_v60 = vand.u32 4294901760, %v1205_v33  ;;  %1278 = vmatpush.msrb.mxu3 %v1277_v54 }
  0xd1   :  { %v786_v16 = vpop.f32.mrf.mxu2 }
  0xd2   :  { %v787_v53 = vadd.f32 %v786_v16, %v754_v23  ;;  %v1202_v16 = vld [vmem:[#allocation2 + $0x98] sm:$0xff]  ;;  %v2621_v23 = vsub.f32 %v1206_v28, %v2608_v1  ;;  %v2632_v42 = vsub.f32 %v1205_v33, %v2613_v60  ;;  %1284 = vmatpush.msrb.mxu3 %v1283_v5  ;;  %v1295_v52 = vand.u32 4294901760, %v1294_v12  ;;  %1239 = vmatpush.msrb.mxu2 %v2613_v60 }
  0xd3   :  { %v811_v46 = vpop.f32.mrf.mxu3  ;;  %v2640_v43 = vand.u32 4294901760, %v1202_v16 }
  0xd4   :  { %v812_v44 = vadd.f32 %v811_v46, %v787_v53  ;;  %v1311_v48 = vand.u32 4294901760, %v2621_v23  ;;  %v2638_v53 = vsub.f32 %v1204_v27, %v2615_v15  ;;  %v1317_v10 = vand.u32 4294901760, %v2632_v42  ;;  %1290 = vmatpush.msrb.mxu3 %v1289_v31  ;;  %1241 = vmatpush.msrb.mxu2 %v2615_v15 }
  0xd5   :  { %v2661_v28 = vsub.f32 %v1202_v16, %v2640_v43  ;;  %v1329_v27 = vand.u32 4294901760, %v2652_v3 }
  0xd6   :  { %v817_v0 = vmax.f32 %v812_v44, 0.0  ;;  %v2644_v44 = vand.u32 4294901760, %v1201_v25  ;;  %v1323_v26 = vand.u32 4294901760, %v2638_v53  ;;  %1296 = vmatpush.msrb.mxu3 %v1295_v52  ;;  %v1318_v33 = vsub.f32 %v2632_v42, %v1317_v10  ;;  %1243 = vmatpush.msrb.mxu2 %v2624_v24 }
  0xd7   :  { %v1330_v12 = vsub.f32 %v2652_v3, %v1329_v27 }
  0xd8   :  { %v824_v8 = vrot.slane %v817_v0, 2  ;;  %v1306_v0 = vsub.f32 %v2618_v22, %v1305_v21  ;;  %v2664_v32 = vsub.f32 %v1201_v25, %v2644_v44  ;;  %v1324_v49 = vsub.f32 %v2638_v53, %v1323_v26  ;;  %1245 = vmatpush.msrb.mxu2 %v2640_v43 }
  0xda   :  { %v828_v40 = vsel %vm827_vm2, %v823_v4, %v824_v8  ;;  %v1200_v4 = vld [vmem:[#allocation2 + $0x88] sm:$0xff]  ;;  %v1301_v8 = vand.u32 4294901760, %v1300_v19  ;;  %v1307_v34 = vand.u32 4294901760, %v1306_v0  ;;  %v1341_v16 = vand.u32 4294901760, %v2664_v32  ;;  %1247 = vmatpush.msrb.mxu2 %v2644_v44 }
  0xdb   :  { %v830_v45 = vsel %vm829_vm3, %v826_v38, %v828_v40  ;;  %v2672_v38 = vand.u32 4294901760, %v1200_v4  ;;  %v1325_v5 = vand.u32 4294901760, %v1324_v49  ;;  %v1331_v19 = vand.u32 4294901760, %v1330_v12  ;;  %v1569_v49 = vld [vmem:[%s3035_s5 + $0x38] sm:$0xff] }
  0xdc   :  { %v835_v11 = vperm.slane %v830_v45, %v834_v17  ;;  %v1312_v17 = vsub.f32 %v2621_v23, %v1311_v48  ;;  %1302 = vmatpush.msrb.mxu3 %v1301_v8  ;;  %v1335_v45 = vand.u32 4294901760, %v2661_v28 }
  0xdd   :  { %v2681_v54 = vsub.f32 %v1200_v4, %v2672_v38  ;;  %1249 = vmatpush.msrb.mxu2 %v2672_v38 }
  0xde   :  { %v2626_v18 = vand.u32 4294901760, %v835_v11  ;;  %v1313_v41 = vand.u32 4294901760, %v1312_v17  ;;  %1308 = vmatpush.msrb.mxu3 %v1307_v34  ;;  %v1336_v25 = vsub.f32 %v2661_v28, %v1335_v45 }
  0xdf   :  { %v1347_v31 = vand.u32 4294901760, %v2681_v54 }
  0xe0   :  { %994 = vmatmul.f32.vlgmr.msra.gmra.mxu1 %v2626_v18  ;;  %v889_v46 = vsub.f32 %v835_v11, %v2626_v18  ;;  %v1319_v11 = vand.u32 4294901760, %v1318_v33  ;;  %1314 = vmatpush.msrb.mxu3 %v1313_v41  ;;  %v1337_v52 = vand.u32 4294901760, %v1336_v25  ;;  %v1570_v41 = vld [vmem:[%s3035_s5 + $0x40] sm:$0xff] }
  0xe1   :  { %1417 = vmatpush.msra.mxu1 %v2541_v35  ;;  %v1348_v0 = vsub.f32 %v2681_v54, %v1347_v31 }
  0xe2   :  { %1048 = vmatmul.f32.vlgmr.msra.gmra.mxu2 %v889_v46  ;;  %v890_v14 = vand.u32 4294901760, %v889_v46  ;;  %1320 = vmatpush.msrb.mxu3 %v1319_v11 }
  0xe3   :  { %1419 = vmatpush.msra.mxu1 %v2543_v36  ;;  %v1349_v4 = vand.u32 4294901760, %v1348_v0  ;;  %v2878_v0 = vand.u32 4294901760, %v1569_v49 }
  0xe4   :  { %1087 = vmatmul.f32.vlgmr.msra.gmra.mxu3 %v890_v14  ;;  %v891_v30 = vsub.f32 %v889_v46, %v890_v14  ;;  %v1342_v46 = vsub.f32 %v2664_v32, %v1341_v16 }
  0xe5   :  { %1421 = vmatpush.msra.mxu1 %v2545_v37  ;;  %1326 = vmatpush.msrb.mxu3 %v1325_v5 }
  0xe6   :  { %v892_v40 = vand.u32 4294901760, %v891_v30  ;;  %v1343_v14 = vand.u32 4294901760, %v1342_v46 }
  0xe7   :  { %1423 = vmatpush.msra.mxu1 %v2547_v55  ;;  %1332 = vmatpush.msrb.mxu3 %v1331_v19  ;;  %v1566_v19 = vld [vmem:[%s3035_s5 + $0x20] sm:$0xff] }
  0xe8   :  { %893 = vmatmul.f32.vlgmr.msra.gmra.mxu0 %v892_v40  ;;  %1193 = vmatmul.f32.vlgmr.msrb.gmra.mxu1 %v2626_v18 }
  0xe9   :  { %1364 = vmatpush.msra.mxu0 %v2554_v6  ;;  %1425 = vmatpush.msra.mxu1 %v2549_v61  ;;  %v1575_v6 = vld [vmem:[%s3035_s5 + $0x68] sm:$0xff] }
  0xea   :  { %1338 = vmatpush.msrb.mxu3 %v1337_v52  ;;  %v2875_v52 = vand.u32 4294901760, %v1570_v41 }
  0xeb   :  { %1367 = vmatpush.msra.mxu0 %v2557_v47  ;;  %1427 = vmatpush.msra.mxu1 %v2551_v2 }
  0xec   :  { %1344 = vmatpush.msrb.mxu3 %v1343_v14 }
  0xed   :  { %1370 = vmatpush.msra.mxu0 %v2560_v50  ;;  %1429 = vmatpush.msra.mxu1 %v2563_v29 }
  0xee   :  { %1350 = vmatpush.msrb.mxu3 %v1349_v4 }
  0xef   :  { %1373 = vmatpush.msra.mxu0 %v2566_v51  ;;  %1431 = vmatpush.msra.mxu1 %v2605_v59  ;;  %v1574_v51 = vld [vmem:[%s3035_s5 + $0x60] sm:$0xff] }
  0xf0   :  { %1156 = vmatmul.f32.vlgmr.msrb.gmra.mxu0 %v2626_v18  ;;  %v1199_v18 = vld [vmem:[#allocation2 + $0x80] sm:$0xff] }
  0xf1   :  { %1376 = vmatpush.msra.mxu0 %v2569_v13  ;;  %1433 = vmatpush.msra.mxu1 %v2608_v1  ;;  %v1250_v8 = vand.u32 4294901760, %v1199_v18  ;;  %v1573_v13 = vld [vmem:[%s3035_s5 + $0x58] sm:$0xff] }
  0xf3   :  { %1379 = vmatpush.msra.mxu0 %v2572_v56  ;;  %1435 = vmatpush.msra.mxu1 %v2613_v60  ;;  %v1352_v17 = vsub.f32 %v1199_v18, %v1250_v8  ;;  %v1572_v56 = vld [vmem:[%s3035_s5 + $0x50] sm:$0xff] }
  0xf4   :  { %1251 = vmatpush.msrb.mxu2 %v1250_v8 }
  0xf5   :  { %1382 = vmatpush.msra.mxu0 %v2581_v9  ;;  %1437 = vmatpush.msra.mxu1 %v2615_v15  ;;  %v1353_v30 = vand.u32 4294901760, %v1352_v17 }
  0xf6   :  { %1458 = vmatpush.msra.mxu2 %v1263_v57 }
  0xf7   :  { %1385 = vmatpush.msra.mxu0 %v2618_v22  ;;  %1439 = vmatpush.msra.mxu1 %v2624_v24  ;;  %v1354_v34 = vsub.f32 %v1352_v17, %v1353_v30 }
  0xf8   :  { %1462 = vmatpush.msra.mxu2 %v1269_v62  ;;  %v2802_v62 = vand.u32 4294901760, %v1574_v51 }
  0xf9   :  { %1388 = vmatpush.msra.mxu0 %v2621_v23  ;;  %1441 = vmatpush.msra.mxu1 %v2640_v43  ;;  %v1355_v33 = vand.u32 4294901760, %v1354_v34  ;;  %v2891_v34 = vsub.f32 %v1570_v41, %v2875_v52 }
  0xfa   :  { %1466 = vmatpush.msra.mxu2 %v1275_v58  ;;  %v2804_v58 = vand.u32 4294901760, %v1573_v13 }
  0xfb   :  { %1391 = vmatpush.msra.mxu0 %v2632_v42  ;;  %1443 = vmatpush.msra.mxu1 %v2644_v44 }
  0xfc   :  { %1470 = vmatpush.msra.mxu2 %v1281_v63  ;;  %1356 = vmatpush.msrb.mxu3 %v1355_v33  ;;  %v2806_v63 = vand.u32 4294901760, %v1572_v56  ;;  %v2827_v22 = vsub.f32 %v1573_v13, %v2804_v58  ;;  %v2894_v33 = vsub.f32 %v1569_v49, %v2878_v0 }
  0xfd   :  { %1394 = vmatpush.msra.mxu0 %v2638_v53  ;;  %1445 = vmatpush.msra.mxu1 %v2672_v38 }
  0xfe   :  { %1525 = vmatpush.msra.mxu3 %v2541_v35  ;;  %1474 = vmatpush.msra.mxu2 %v1287_v7  ;;  %v1948_v35 = vld [vmem:[%s3034_s4] ss:$0 sm:$0xff]  ;;  %v1571_v7 = vld [vmem:[%s3035_s5 + $0x48] sm:$0xff]  ;;  %v2830_v23 = vsub.f32 %v1572_v56, %v2806_v63 }
  0xff   :  { %1397 = vmatpush.msra.mxu0 %v2652_v3  ;;  %1447 = vmatpush.msra.mxu1 %v1250_v8 }
 0x100   :  { %1527 = vmatpush.msra.mxu3 %v2543_v36  ;;  %1478 = vmatpush.msra.mxu2 %v1293_v20  ;;  %v1655_v40 = vand.u32 4294901760, %v2830_v23 }
 0x101   :  { %1400 = vmatpush.msra.mxu0 %v2661_v28 }
 0x102   :  { %1529 = vmatpush.msra.mxu3 %v2545_v37  ;;  %1482 = vmatpush.msra.mxu2 %v1299_v39 }
 0x103   :  { %1403 = vmatpush.msra.mxu0 %v2664_v32 }
 0x104   :  { %1531 = vmatpush.msra.mxu3 %v2547_v55  ;;  %1486 = vmatpush.msra.mxu2 %v1305_v21 }
 0x105   :  { %1406 = vmatpush.msra.mxu0 %v2681_v54 }
 0x106   :  { %1533 = vmatpush.msra.mxu3 %v2549_v61  ;;  %1490 = vmatpush.msra.mxu2 %v1311_v48  ;;  %v1577_v61 = vld [vmem:[%s3035_s5 + $0x78] sm:$0xff] }
 0x107   :  { %1409 = vmatpush.msra.mxu0 %v1352_v17  ;;  %v2787_v47 = vand.u32 4294901760, %v1577_v61 }
 0x108   :  { %1535 = vmatpush.msra.mxu3 %v2551_v2  ;;  %1494 = vmatpush.msra.mxu2 %v1317_v10  ;;  %v1576_v2 = vld [vmem:[%s3035_s5 + $0x70] sm:$0xff] }
 0x109   :  { %v2789_v50 = vand.u32 4294901760, %v1576_v2  ;;  %v2812_v20 = vsub.f32 %v1577_v61, %v2787_v47  ;;  %1583 = vmatpush.msrb.mxu0 %v2787_v47 }
 0x10a   :  { %1537 = vmatpush.msra.mxu3 %v2563_v29  ;;  %1498 = vmatpush.msra.mxu2 %v1323_v26  ;;  %v2791_v29 = vand.u32 4294901760, %v1575_v6 }
 0x10b   :  { %v2815_v39 = vsub.f32 %v1576_v2, %v2789_v50  ;;  %v1625_v42 = vand.u32 4294901760, %v2812_v20  ;;  %1585 = vmatpush.msrb.mxu0 %v2789_v50  ;;  %v1667_v2 = vand.u32 4294901760, %v2891_v34 }
 0x10c   :  { %1539 = vmatpush.msra.mxu3 %v2605_v59  ;;  %1502 = vmatpush.msra.mxu2 %v1329_v27  ;;  %v2818_v59 = vsub.f32 %v1575_v6, %v2791_v29  ;;  %v1673_v6 = vand.u32 4294901760, %v2894_v33 }
 0x10d   :  { %v1631_v21 = vand.u32 4294901760, %v2815_v39  ;;  %v1626_v26 = vsub.f32 %v2812_v20, %v1625_v42  ;;  %1587 = vmatpush.msrb.mxu0 %v2791_v29 }
 0x10e   :  { %1541 = vmatpush.msra.mxu3 %v2608_v1  ;;  %1506 = vmatpush.msra.mxu2 %v1335_v45  ;;  %v2821_v1 = vand.u32 4294901760, %v1571_v7  ;;  %v1637_v48 = vand.u32 4294901760, %v2818_v59  ;;  %v1568_v45 = vld [vmem:[%s3035_s5 + $0x30] sm:$0xff] }
 0x10f   :  { %v1632_v28 = vsub.f32 %v2815_v39, %v1631_v21  ;;  %v1627_v11 = vand.u32 4294901760, %v1626_v26  ;;  %1589 = vmatpush.msrb.mxu0 %v2802_v62  ;;  %v2880_v14 = vand.u32 4294901760, %v1568_v45 }
 0x110   :  { %1543 = vmatpush.msra.mxu3 %v2613_v60  ;;  %1510 = vmatpush.msra.mxu2 %v1341_v16  ;;  %v2839_v10 = vsub.f32 %v1571_v7, %v2821_v1  ;;  %v1638_v32 = vsub.f32 %v2818_v59, %v1637_v48  ;;  %v1567_v16 = vld [vmem:[%s3035_s5 + $0x28] sm:$0xff]  ;;  %v1668_v7 = vsub.f32 %v2891_v34, %v1667_v2 }
 0x111   :  { %v1633_v12 = vand.u32 4294901760, %v1632_v28  ;;  %1628 = vmatpush.msrb.mxu1 %v1627_v11  ;;  %1591 = vmatpush.msrb.mxu0 %v2804_v58  ;;  %v2885_v17 = vand.u32 4294901760, %v1567_v16 }
 0x112   :  { %1545 = vmatpush.msra.mxu3 %v2615_v15  ;;  %1514 = vmatpush.msra.mxu2 %v1347_v31  ;;  %v2824_v15 = vsub.f32 %v1574_v51, %v2802_v62  ;;  %v1661_v31 = vand.u32 4294901760, %v2839_v10  ;;  %v1639_v46 = vand.u32 4294901760, %v1638_v32 }
 0x113   :  { %1634 = vmatpush.msrb.mxu1 %v1633_v12  ;;  %1593 = vmatpush.msrb.mxu0 %v2806_v63  ;;  %v2909_v51 = vsub.f32 %v1567_v16, %v2885_v17 }
 0x114   :  { %1547 = vmatpush.msra.mxu3 %v2624_v24  ;;  %1518 = vmatpush.msra.mxu2 %v1353_v30  ;;  %v1565_v30 = vld [vmem:[%s3035_s5 + $0x18] sm:$0xff]  ;;  %v1662_v61 = vsub.f32 %v2839_v10, %v1661_v31 }
 0x115   :  { %1640 = vmatpush.msrb.mxu1 %v1639_v46  ;;  %1595 = vmatpush.msrb.mxu0 %v2821_v1  ;;  %v2911_v13 = vand.u32 4294901760, %v1565_v30  ;;  %v1685_v26 = vand.u32 4294901760, %v2909_v51 }
 0x116   :  { %1549 = vmatpush.msra.mxu3 %v2640_v43  ;;  %v1643_v43 = vand.u32 4294901760, %v2824_v15 }
 0x117   :  { %1597 = vmatpush.msrb.mxu0 %v2875_v52  ;;  %v2928_v28 = vsub.f32 %v1565_v30, %v2911_v13 }
 0x118   :  { %1551 = vmatpush.msra.mxu3 %v2644_v44  ;;  %v1649_v44 = vand.u32 4294901760, %v2827_v22 }
 0x119   :  { %1599 = vmatpush.msrb.mxu0 %v2878_v0  ;;  %v1697_v11 = vand.u32 4294901760, %v2928_v28 }
 0x11a   :  { %1553 = vmatpush.msra.mxu3 %v2672_v38  ;;  %v1644_v38 = vsub.f32 %v2824_v15, %v1643_v43  ;;  %v1650_v25 = vsub.f32 %v2827_v22, %v1649_v44 }
 0x11b   :  { %1601 = vmatpush.msrb.mxu0 %v2880_v14 }
 0x11c   :  { %1555 = vmatpush.msra.mxu3 %v1250_v8  ;;  %v1645_v18 = vand.u32 4294901760, %v1644_v38  ;;  %v1656_v8 = vsub.f32 %v2830_v23, %v1655_v40 }
 0x11d   :  { %1603 = vmatpush.msrb.mxu0 %v2885_v17 }
 0x11e   :  { %1646 = vmatpush.msrb.mxu1 %v1645_v18 }
 0x15d   :  { %v995_v36 = vpop.f32.mrf.mxu1 }
 0x165   :  { %v894_v37 = vpop.f32.mrf.mxu0  ;;  %v1049_v9 = vpop.f32.mrf.mxu2 }
 0x166   :  { %v895_v55 = vadd.f32 %v1948_v35, %v894_v37  ;;  %v1194_v54 = vpop.f32.mrf.mxu1  ;;  %v2898_v35 = vsub.f32 %v1568_v45, %v2880_v14 }
 0x167   :  { %v1088_v24 = vpop.f32.mrf.mxu3 }
 0x168   :  { %v996_v57 = vadd.f32 %v995_v36, %v895_v55  ;;  %v2900_v36 = vand.u32 4294901760, %v1566_v19  ;;  %v1651_v55 = vand.u32 4294901760, %v1650_v25  ;;  %v1698_v25 = vsub.f32 %v2928_v28, %v1697_v11 }
 0x16a   :  { %v1050_v60 = vadd.f32 %v1049_v9, %v996_v57  ;;  %v1657_v57 = vand.u32 4294901760, %v1656_v8  ;;  %v1679_v9 = vand.u32 4294901760, %v2898_v35  ;;  %1652 = vmatpush.msrb.mxu1 %v1651_v55  ;;  %1605 = vmatpush.msrb.mxu0 %v2900_v36  ;;  %v1699_v46 = vand.u32 4294901760, %v1698_v25  ;;  %v1563_v8 = vld [vmem:[%s3035_s5 + $0x8] sm:$0xff]  ;;  %v1562_v55 = vld [vmem:[%s3035_s5] sm:$0xff] }
 0x16c   :  { %v1089_v53 = vadd.f32 %v1088_v24, %v1050_v60  ;;  %v2919_v60 = vsub.f32 %v1566_v19, %v2900_v36  ;;  %1658 = vmatpush.msrb.mxu1 %v1657_v57  ;;  %v1680_v38 = vsub.f32 %v2898_v35, %v1679_v9  ;;  %1607 = vmatpush.msrb.mxu0 %v2911_v13  ;;  %v1612_v57 = vand.u32 4294901760, %v1562_v55 }
 0x16d   :  { %v1157_v3 = vpop.f32.mrf.mxu0 }
 0x16e   :  { %v1158_v27 = vadd.f32 %v1157_v3, %v1089_v53  ;;  %v1663_v53 = vand.u32 4294901760, %v1662_v61  ;;  %v1674_v3 = vsub.f32 %v2894_v33, %v1673_v6  ;;  %v1691_v41 = vand.u32 4294901760, %v2919_v60 }
 0x16f   :  { %v1681_v12 = vand.u32 4294901760, %v1680_v38 }
 0x170   :  { %v1195_v5 = vadd.f32 %v1194_v54, %v1158_v27  ;;  %v1669_v27 = vand.u32 4294901760, %v1668_v7  ;;  %1664 = vmatpush.msrb.mxu1 %v1663_v53  ;;  %v1675_v45 = vand.u32 4294901760, %v1674_v3  ;;  %v1686_v54 = vsub.f32 %v2909_v51, %v1685_v26 }
 0x171   :  { %v1692_v16 = vsub.f32 %v2919_v60, %v1691_v41  ;;  %v1714_v53 = vsub.f32 %v1562_v55, %v1612_v57 }
 0x172   :  { %v1197_v4 = vmax.f32 %v1195_v5, 0.0  ;;  %1670 = vmatpush.msrb.mxu1 %v1669_v27  ;;  %v1687_v5 = vand.u32 4294901760, %v1686_v54 }
 0x173   :  { %v1693_v19 = vand.u32 4294901760, %v1692_v16  ;;  %v1715_v27 = vand.u32 4294901760, %v1714_v53 }
 0x174   :  { %v1252_v37 = vand.u32 4294901760, %v1197_v4  ;;  %1676 = vmatpush.msrb.mxu1 %v1675_v45 }
 0x176   :  { %v1253_v56 = vsub.f32 %v1197_v4, %v1252_v37  ;;  %1358 = vmatmul.f32.vlgmr.msrb.gmra.mxu3 %v1252_v37  ;;  %1682 = vmatpush.msrb.mxu1 %v1681_v12  ;;  %v1564_v4 = vld [vmem:[%s3035_s5 + $0x10] sm:$0xff] }
 0x177   :  { %1779 = vmatpush.msrb.mxu3 %v2787_v47  ;;  %v1608_v18 = vand.u32 4294901760, %v1564_v4 }
 0x178   :  { %1412 = vmatmul.f32.vlgmr.msra.gmra.mxu0 %v1253_v56  ;;  %v1254_v24 = vand.u32 4294901760, %v1253_v56  ;;  %1688 = vmatpush.msrb.mxu1 %v1687_v5 }
 0x179   :  { %1781 = vmatpush.msrb.mxu3 %v2789_v50  ;;  %v1702_v30 = vsub.f32 %v1564_v4, %v1608_v18  ;;  %1609 = vmatpush.msrb.mxu0 %v1608_v18 }
 0x17a   :  { %1451 = vmatmul.f32.vlgmr.msra.gmra.mxu1 %v1254_v24  ;;  %v1255_v32 = vsub.f32 %v1253_v56, %v1254_v24 }
 0x17b   :  { %1783 = vmatpush.msrb.mxu3 %v2791_v29  ;;  %1694 = vmatpush.msrb.mxu1 %v1693_v19  ;;  %v1703_v61 = vand.u32 4294901760, %v1702_v30 }
 0x17c   :  { %v1256_v49 = vand.u32 4294901760, %v1255_v32 }
 0x17d   :  { %1785 = vmatpush.msrb.mxu3 %v2802_v62  ;;  %1700 = vmatpush.msrb.mxu1 %v1699_v46  ;;  %v1704_v7 = vsub.f32 %v1702_v30, %v1703_v61 }
 0x17e   :  { %1257 = vmatmul.f32.vlgmr.msrb.gmra.mxu2 %v1256_v49  ;;  %1557 = vmatmul.f32.vlgmr.msra.gmra.mxu3 %v1252_v37  ;;  %v1716_v49 = vsub.f32 %v1714_v53, %v1715_v27 }
 0x17f   :  { %1726 = vmatpush.msrb.mxu2 %v2812_v20  ;;  %1787 = vmatpush.msrb.mxu3 %v2804_v58  ;;  %v1705_v3 = vand.u32 4294901760, %v1704_v7 }
 0x180   :  { %v1717_v45 = vand.u32 4294901760, %v1716_v49 }
 0x181   :  { %1729 = vmatpush.msrb.mxu2 %v2815_v39  ;;  %1789 = vmatpush.msrb.mxu3 %v2806_v63 }
 0x182   :  { %1706 = vmatpush.msrb.mxu1 %v1705_v3 }
 0x183   :  { %1732 = vmatpush.msrb.mxu2 %v2818_v59  ;;  %1791 = vmatpush.msrb.mxu3 %v2821_v1 }
 0x185   :  { %1735 = vmatpush.msrb.mxu2 %v2824_v15  ;;  %1793 = vmatpush.msrb.mxu3 %v2875_v52 }
 0x186   :  { %1520 = vmatmul.f32.vlgmr.msra.gmra.mxu2 %v1252_v37  ;;  %v1610_v37 = vand.u32 4294901760, %v1563_v8 }
 0x187   :  { %1738 = vmatpush.msrb.mxu2 %v2827_v22  ;;  %1795 = vmatpush.msrb.mxu3 %v2878_v0 }
 0x188   :  { %v1708_v56 = vsub.f32 %v1563_v8, %v1610_v37  ;;  %1611 = vmatpush.msrb.mxu0 %v1610_v37 }
 0x189   :  { %1741 = vmatpush.msrb.mxu2 %v2830_v23  ;;  %1797 = vmatpush.msrb.mxu3 %v2880_v14 }
 0x18a   :  { %v1709_v24 = vand.u32 4294901760, %v1708_v56  ;;  %1613 = vmatpush.msrb.mxu0 %v1612_v57 }
 0x18b   :  { %1744 = vmatpush.msrb.mxu2 %v2839_v10  ;;  %1799 = vmatpush.msrb.mxu3 %v2885_v17 }
 0x18c   :  { %1820 = vmatpush.msra.mxu0 %v1625_v42  ;;  %v1710_v32 = vsub.f32 %v1708_v56, %v1709_v24 }
 0x18d   :  { %1747 = vmatpush.msrb.mxu2 %v2891_v34  ;;  %1801 = vmatpush.msrb.mxu3 %v2900_v36 }
 0x18e   :  { %1824 = vmatpush.msra.mxu0 %v1631_v21  ;;  %v1711_v38 = vand.u32 4294901760, %v1710_v32 }
 0x18f   :  { %1750 = vmatpush.msrb.mxu2 %v2894_v33  ;;  %1803 = vmatpush.msrb.mxu3 %v2911_v13 }
 0x190   :  { %1828 = vmatpush.msra.mxu0 %v1637_v48  ;;  %1712 = vmatpush.msrb.mxu1 %v1711_v38 }
 0x191   :  { %1753 = vmatpush.msrb.mxu2 %v2898_v35  ;;  %1805 = vmatpush.msrb.mxu3 %v1608_v18 }
 0x192   :  { %1832 = vmatpush.msra.mxu0 %v1643_v43  ;;  %1718 = vmatpush.msrb.mxu1 %v1717_v45 }
 0x193   :  { %1756 = vmatpush.msrb.mxu2 %v2909_v51  ;;  %1807 = vmatpush.msrb.mxu3 %v1610_v37 }
 0x194   :  { %1887 = vmatpush.msra.mxu1 %v2787_v47  ;;  %1836 = vmatpush.msra.mxu0 %v1649_v44  ;;  %v1949_v47 = vld [vmem:[%s3034_s4 + $0x1] ss:$0 sm:$0xff] }
 0x195   :  { %1759 = vmatpush.msrb.mxu2 %v2919_v60  ;;  %1809 = vmatpush.msrb.mxu3 %v1612_v57 }
 0x196   :  { %1889 = vmatpush.msra.mxu1 %v2789_v50  ;;  %1840 = vmatpush.msra.mxu0 %v1655_v40  ;;  %v1950_v40 = vld [vmem:[%s3036_s6] ss:$0 sm:$0xff] }
 0x197   :  { %1762 = vmatpush.msrb.mxu2 %v2928_v28 }
 0x198   :  { %1891 = vmatpush.msra.mxu1 %v2791_v29  ;;  %1844 = vmatpush.msra.mxu0 %v1661_v31 }
 0x199   :  { %1765 = vmatpush.msrb.mxu2 %v1702_v30 }
 0x19a   :  { %1893 = vmatpush.msra.mxu1 %v2802_v62  ;;  %1848 = vmatpush.msra.mxu0 %v1667_v2 }
 0x19b   :  { %1768 = vmatpush.msrb.mxu2 %v1708_v56 }
 0x19c   :  { %1895 = vmatpush.msra.mxu1 %v2804_v58  ;;  %1852 = vmatpush.msra.mxu0 %v1673_v6 }
 0x19d   :  { %1771 = vmatpush.msrb.mxu2 %v1714_v53 }
 0x19e   :  { %1897 = vmatpush.msra.mxu1 %v2806_v63  ;;  %1856 = vmatpush.msra.mxu0 %v1679_v9 }
 0x1a0   :  { %1899 = vmatpush.msra.mxu1 %v2821_v1  ;;  %1860 = vmatpush.msra.mxu0 %v1685_v26 }
 0x1a2   :  { %1901 = vmatpush.msra.mxu1 %v2875_v52  ;;  %1864 = vmatpush.msra.mxu0 %v1691_v41 }
 0x1a4   :  { %1903 = vmatpush.msra.mxu1 %v2878_v0  ;;  %1868 = vmatpush.msra.mxu0 %v1697_v11 }
 0x1a6   :  { %1905 = vmatpush.msra.mxu1 %v2880_v14  ;;  %1872 = vmatpush.msra.mxu0 %v1703_v61 }
 0x1a8   :  { %1907 = vmatpush.msra.mxu1 %v2885_v17  ;;  %1876 = vmatpush.msra.mxu0 %v1709_v24 }
 0x1aa   :  { %1909 = vmatpush.msra.mxu1 %v2900_v36  ;;  %1880 = vmatpush.msra.mxu0 %v1715_v27 }
 0x1ac   :  { %1911 = vmatpush.msra.mxu1 %v2911_v13 }
 0x1ae   :  { %1913 = vmatpush.msra.mxu1 %v1608_v18 }
 0x1b0   :  { %1915 = vmatpush.msra.mxu1 %v1610_v37 }
 0x1b2   :  { %1917 = vmatpush.msra.mxu1 %v1612_v57 }
 0x1f5   :  { %v1413_v63 = vpop.f32.mrf.mxu0 }
 0x1f7   :  { %v1452_v39 = vpop.f32.mrf.mxu1 }
 0x1f9   :  { %v1359_v50 = vpop.f32.mrf.mxu3 }
 0x201   :  { %v1258_v29 = vpop.f32.mrf.mxu2  ;;  %v1558_v22 = vpop.f32.mrf.mxu3 }
 0x202   :  { %v1259_v62 = vadd.f32 %v1949_v47, %v1258_v29 }
 0x204   :  { %v1360_v58 = vadd.f32 %v1359_v50, %v1259_v62 }
 0x206   :  { %v1414_v20 = vadd.f32 %v1413_v63, %v1360_v58 }
 0x208   :  { %v1453_v59 = vadd.f32 %v1452_v39, %v1414_v20 }
 0x209   :  { %v1521_v1 = vpop.f32.mrf.mxu2 }
 0x20a   :  { %v1522_v15 = vadd.f32 %v1521_v1, %v1453_v59 }
 0x20c   :  { %v1559_v23 = vadd.f32 %v1558_v22, %v1522_v15 }
 0x20e   :  { %v1561_v42 = vmax.f32 %v1559_v23, 0.0 }
 0x210   :  { %v1614_v21 = vand.u32 4294901760, %v1561_v42 }
 0x212   :  { %v1615_v48 = vsub.f32 %v1561_v42, %v1614_v21  ;;  %1720 = vmatmul.f32.vlgmr.msrb.gmra.mxu1 %v1614_v21 }
 0x214   :  { %1774 = vmatmul.f32.vlgmr.msrb.gmra.mxu2 %v1615_v48  ;;  %v1616_v43 = vand.u32 4294901760, %v1615_v48 }
 0x216   :  { %1813 = vmatmul.f32.vlgmr.msrb.gmra.mxu3 %v1616_v43  ;;  %v1617_v44 = vsub.f32 %v1615_v48, %v1616_v43 }
 0x218   :  { %v1618_v10 = vand.u32 4294901760, %v1617_v44 }
 0x21a   :  { %1619 = vmatmul.f32.vlgmr.msrb.gmra.mxu0 %v1618_v10  ;;  %1919 = vmatmul.f32.vlgmr.msra.gmra.mxu1 %v1614_v21 }
 0x222   :  { %1882 = vmatmul.f32.vlgmr.msra.gmra.mxu0 %v1614_v21 }
 0x28f   :  { %v1721_v31 = vpop.f32.mrf.mxu1 }
 0x297   :  { %v1620_v52 = vpop.f32.mrf.mxu0  ;;  %v1775_v17 = vpop.f32.mrf.mxu2 }
 0x298   :  { %v1621_v0 = vadd.f32 %v1950_v40, %v1620_v52  ;;  %v1920_v6 = vpop.f32.mrf.mxu1 }
 0x299   :  { %v1814_v33 = vpop.f32.mrf.mxu3 }
 0x29a   :  { %v1722_v14 = vadd.f32 %v1721_v31, %v1621_v0 }
 0x29c   :  { %v1776_v34 = vadd.f32 %v1775_v17, %v1722_v14 }
 0x29e   :  { %v1815_v35 = vadd.f32 %v1814_v33, %v1776_v34 }
 0x29f   :  { %v1883_v36 = vpop.f32.mrf.mxu0 }
 0x2a0   :  { %v1884_v2 = vadd.f32 %v1883_v36, %v1815_v35 }
 0x2a2   :  { %v1921_v51 = vadd.f32 %v1920_v6, %v1884_v2 }
 0x2a4   :  { %1924 = vst.msk [vmem:[#allocation5] sm:$0xff] %vm1923_vm4, %v1921_v51 }
 0x2a5   :  { %1935 = dma.vmem_to_hbm [thread:$0]  %s1931_s25, 128, %s1933_s28, [#allocation4]  }
 0x2a6   :  { %2001 = dma.done.wait [#allocation4], 128  }
 0x2a7   :  { %2002 = vsyncadd [#allocation4], 4294967168 }
 0x2a8   :  { %1940 = vsyncpa [#allocation3], 1 }
 0x2a9   :  { %1941 = vsyncpa [#allocation4], 1 }

</bundles_post_ra>
